<compile_context>
chip_gen: v7x
topology: tpu7x:2x2x1
jax: 0.10.0
libtpu: 0.0.40
codegen_flags: <defaults>
</compile_context>

<pallas_src>
import jax
import jax.numpy as jnp
from jax.experimental import pallas as pl
from jax.experimental.pallas import tpu as pltpu


# ----------------------------------------------------------------------------
# Fused whole-model kernel (all layers, both directions, FC head)
# ----------------------------------------------------------------------------
def _make_fused_kernel(num_layers, T, B, H):
    def kernel(*refs):
        # inputs
        x_ref = refs[0]                               # (T*B, D0) time-major rows
        layer_refs = refs[1:1 + 6 * num_layers]       # per layer: wih_f, wih_b, whh_f, whh_b, b_f, b_b
        fc_w_ref = refs[1 + 6 * num_layers]           # (2H, C)
        fc_b_ref = refs[2 + 6 * num_layers]           # (1, C)
        # output
        out_ref = refs[3 + 6 * num_layers]            # (B, C)

        def lstm_cell(gates, c_prev):
            i = jax.nn.sigmoid(gates[:, 0 * H:1 * H])
            f = jax.nn.sigmoid(gates[:, 1 * H:2 * H])
            g = jnp.tanh(gates[:, 2 * H:3 * H])
            o = jax.nn.sigmoid(gates[:, 3 * H:4 * H])
            c_new = f * c_prev + i * g
            return o * jnp.tanh(c_new), c_new

        x_in = x_ref[...]                             # (T*B, D_in) for current layer
        h_last_f = None
        h_last_b = None

        for layer in range(num_layers):
            (wih_f_ref, wih_b_ref, whh_f_ref, whh_b_ref,
             b_f_ref, b_b_ref) = layer_refs[6 * layer:6 * layer + 6]
            is_last = layer == num_layers - 1

            # ---- hoisted per-direction input projections: big MXU matmuls,
            #      bias folded in, done once per layer (off the serial path) ----
            xproj_f = (jnp.dot(x_in, wih_f_ref[...],
                               preferred_element_type=jnp.float32) + b_f_ref[...])  # (T*B, 4H)
            xproj_b = (jnp.dot(x_in, wih_b_ref[...],
                               preferred_element_type=jnp.float32) + b_b_ref[...])  # (T*B, 4H)

            # recurrent weights loaded once per layer, stay in vregs
            whh_f = whh_f_ref[...]                    # (H, 4H)
            whh_b = whh_b_ref[...]                    # (H, 4H)

            # register-carried state; fwd / bwd are independent dependency chains
            h_f = jnp.zeros((B, H), jnp.float32)
            c_f = jnp.zeros((B, H), jnp.float32)
            h_b = jnp.zeros((B, H), jnp.float32)
            c_b = jnp.zeros((B, H), jnp.float32)

            outs_f = []                               # fwd h, in time order t = 0..T-1
            outs_b = []                               # bwd h, in step order (time T-1..0)

            for t in range(T):                        # static unroll, constant offsets
                rt = T - 1 - t                        # backward-direction time index
                if t == 0:
                    # h0 == 0 -> recurrent contribution is exactly zero
                    gf = xproj_f[0:B, :]
                    gb = xproj_b[rt * B:(rt + 1) * B, :]
                else:
                    gf = (jnp.dot(h_f, whh_f, preferred_element_type=jnp.float32)
                          + xproj_f[t * B:(t + 1) * B, :])
                    gb = (jnp.dot(h_b, whh_b, preferred_element_type=jnp.float32)
                          + xproj_b[rt * B:(rt + 1) * B, :])

                h_f, c_f = lstm_cell(gf, c_f)
                h_b, c_b = lstm_cell(gb, c_b)

                if not is_last:
                    outs_f.append(h_f)
                    outs_b.append(h_b)
                else:
                    # FC head only needs fwd h at time T-1 and bwd h at time T-1
                    # (bwd step t == 0 processes x_{T-1}).
                    if t == T - 1:
                        h_last_f = h_f
                    if t == 0:
                        h_last_b = h_b

            if not is_last:
                # Build next layer's input sequence once, off the critical path:
                # rows grouped by time, columns = [fwd_t | bwd_t] (PyTorch layout).
                x_f = jnp.concatenate(outs_f, axis=0)          # (T*B, H), time order
                x_b = jnp.concatenate(outs_b[::-1], axis=0)    # (T*B, H), time order
                x_in = jnp.concatenate([x_f, x_b], axis=1)     # (T*B, 2H)

        # ---- FC head ----
        feat = jnp.concatenate([h_last_f, h_last_b], axis=1)   # (B, 2H)
        out_ref[...] = (jnp.dot(feat, fc_w_ref[...],
                                preferred_element_type=jnp.float32) + fc_b_ref[...])

    return kernel


# ----------------------------------------------------------------------------
# Wrapper
# ----------------------------------------------------------------------------
@jax.jit
def regime_bilstm_forward(x, params):
    """x: (B, T, input_size) batch_first, like the PyTorch module."""
    B, T, D0 = x.shape
    layers = params["layers"]
    num_layers = len(layers)
    H = layers[0]["whh_f"].shape[0]
    C = params["fc_w"].shape[1]

    # time-major, flattened to 2-D so the hoisted projections are plain matmuls
    x2d = jnp.transpose(x, (1, 0, 2)).reshape(T * B, D0)

    args = [x2d]
    for lp in layers:
        args += [lp["wih_f"], lp["wih_b"], lp["whh_f"], lp["whh_b"],
                 lp["b_f"], lp["b_b"]]
    args += [params["fc_w"], params["fc_b"]]

    vmem = pl.BlockSpec(memory_space=pltpu.MemorySpace.VMEM)
    return pl.pallas_call(
        _make_fused_kernel(num_layers, T, B, H),
        out_shape=jax.ShapeDtypeStruct((B, C), jnp.float32),
        in_specs=[vmem] * len(args),
        out_specs=vmem,
    )(*args)


# ----------------------------------------------------------------------------
# Parameter construction (mirrors nn.LSTM / nn.Linear shapes)
# ----------------------------------------------------------------------------
def init_params(key, input_size, hidden_size, num_layers, num_classes):
    k = 1.0 / jnp.sqrt(hidden_size)
    params = {"lstm": []}
    for layer in range(num_layers):
        d_in = input_size if layer == 0 else 2 * hidden_size
        layer_p = {}
        for tag in ("f", "b"):  # forward / reverse direction
            key, k1, k2, k3, k4 = jax.random.split(key, 5)
            layer_p[f"w_ih_{tag}"] = jax.random.uniform(
                k1, (d_in, 4 * hidden_size), minval=-k, maxval=k, dtype=jnp.float32)
            layer_p[f"w_hh_{tag}"] = jax.random.uniform(
                k2, (hidden_size, 4 * hidden_size), minval=-k, maxval=k, dtype=jnp.float32)
            b_ih = jax.random.uniform(k3, (4 * hidden_size,), minval=-k, maxval=k,
                                      dtype=jnp.float32)
            b_hh = jax.random.uniform(k4, (4 * hidden_size,), minval=-k, maxval=k,
                                      dtype=jnp.float32)
            layer_p[f"b_{tag}"] = (b_ih + b_hh).reshape(1, 4 * hidden_size)
        params["lstm"].append(layer_p)
    key, k1, k2 = jax.random.split(key, 3)
    kf = 1.0 / jnp.sqrt(2 * hidden_size)
    params["fc_w"] = jax.random.uniform(k1, (2 * hidden_size, num_classes),
                                        minval=-kf, maxval=kf, dtype=jnp.float32)
    params["fc_b"] = jax.random.uniform(k2, (1, num_classes),
                                        minval=-kf, maxval=kf, dtype=jnp.float32)
    return params


def fuse_params(raw):
    """Kernel-ready per-direction weights (already pre-transposed / bias-combined)."""
    layers = []
    for lp in raw["lstm"]:
        layers.append({
            "wih_f": lp["w_ih_f"], "wih_b": lp["w_ih_b"],
            "whh_f": lp["w_hh_f"], "whh_b": lp["w_hh_b"],
            "b_f": lp["b_f"], "b_b": lp["b_b"],
        })
    return {"layers": layers, "fc_w": raw["fc_w"], "fc_b": raw["fc_b"]}


# ----------------------------------------------------------------------------
# Pure-JAX reference (same math, no Pallas) for a correctness sanity check
# ----------------------------------------------------------------------------
def _ref_lstm_dir(x_seq, w_ih, w_hh, b):
    T, B, _ = x_seq.shape
    H = w_hh.shape[0]
    h = jnp.zeros((B, H), jnp.float32)
    c = jnp.zeros((B, H), jnp.float32)
    outs = []
    for t in range(T):
        gates = x_seq[t] @ w_ih + h @ w_hh + b
        i = jax.nn.sigmoid(gates[:, 0 * H:1 * H])
        f = jax.nn.sigmoid(gates[:, 1 * H:2 * H])
        g = jnp.tanh(gates[:, 2 * H:3 * H])
        o = jax.nn.sigmoid(gates[:, 3 * H:4 * H])
        c = f * c + i * g
        h = o * jnp.tanh(c)
        outs.append(h)
    return jnp.stack(outs, axis=0)


def _ref_forward(x, raw):
    h = jnp.transpose(x, (1, 0, 2))
    for layer in raw["lstm"]:
        fwd = _ref_lstm_dir(h, layer["w_ih_f"], layer["w_hh_f"], layer["b_f"])
        bwd = jnp.flip(
            _ref_lstm_dir(jnp.flip(h, axis=0),
                          layer["w_ih_b"], layer["w_hh_b"], layer["b_b"]),
            axis=0,
        )
        h = jnp.concatenate([fwd, bwd], axis=-1)
    return h[-1] @ raw["fc_w"] + raw["fc_b"]


# ----------------------------------------------------------------------------
if __name__ == "__main__":
    B, T = 2, 8
    input_size, hidden_size, num_layers, num_classes = 16, 32, 2, 4

    key = jax.random.PRNGKey(0)
    key, xk, pk = jax.random.split(key, 3)
    x = jax.random.normal(xk, (B, T, input_size), dtype=jnp.float32)
    raw_params = init_params(pk, input_size, hidden_size, num_layers, num_classes)
    fused_params = fuse_params(raw_params)

    out = jax.block_until_ready(regime_bilstm_forward(x, fused_params))
    assert out.shape == (B, num_classes)

    ref = jax.block_until_ready(_ref_forward(x, raw_params))
    assert jnp.allclose(out, ref, rtol=1e-3, atol=1e-3), "mismatch vs reference"

    print("KERNEL_OK")
</pallas_src>

<mosaic_0001>
module attributes {stable_mosaic.version = 11 : i64} {
  func.func @kernel(%arg0: memref<16x16xf32, #tpu.memory_space<vmem>>, %arg1: memref<16x128xf32, #tpu.memory_space<vmem>>, %arg2: memref<16x128xf32, #tpu.memory_space<vmem>>, %arg3: memref<32x128xf32, #tpu.memory_space<vmem>>, %arg4: memref<32x128xf32, #tpu.memory_space<vmem>>, %arg5: memref<1x128xf32, #tpu.memory_space<vmem>>, %arg6: memref<1x128xf32, #tpu.memory_space<vmem>>, %arg7: memref<64x128xf32, #tpu.memory_space<vmem>>, %arg8: memref<64x128xf32, #tpu.memory_space<vmem>>, %arg9: memref<32x128xf32, #tpu.memory_space<vmem>>, %arg10: memref<32x128xf32, #tpu.memory_space<vmem>>, %arg11: memref<1x128xf32, #tpu.memory_space<vmem>>, %arg12: memref<1x128xf32, #tpu.memory_space<vmem>>, %arg13: memref<64x4xf32, #tpu.memory_space<vmem>>, %arg14: memref<1x4xf32, #tpu.memory_space<vmem>>, %arg15: memref<2x4xf32, #tpu.memory_space<vmem>>) attributes {dimension_semantics = [], scalar_prefetch = 0 : i64, scratch_operands = 0 : i64, tpu.core_type = #tpu.core_type<tc>} {
    %c0 = arith.constant 0 : index
    %c0_0 = arith.constant 0 : index
    %0 = vector.load %arg0[%c0, %c0_0] : memref<16x16xf32, #tpu.memory_space<vmem>>, vector<16x16xf32>
    %c0_1 = arith.constant 0 : index
    %c0_2 = arith.constant 0 : index
    %1 = vector.load %arg1[%c0_1, %c0_2] : memref<16x128xf32, #tpu.memory_space<vmem>>, vector<16x128xf32>
    %cst = arith.constant dense<0.000000e+00> : vector<16x128xf32>
    %2 = tpu.matmul %0, %1, %cst {dimension_numbers = #tpu.dot_dimension_numbers<[1], [0], [0], [1], [0, 0, 1, 1], [], []>} : vector<16x16xf32>, vector<16x128xf32>, vector<16x128xf32> -> vector<16x128xf32>
    %c0_3 = arith.constant 0 : index
    %c0_4 = arith.constant 0 : index
    %3 = vector.load %arg5[%c0_3, %c0_4] : memref<1x128xf32, #tpu.memory_space<vmem>>, vector<1x128xf32>
    %4 = vector.broadcast %3 : vector<1x128xf32> to vector<16x128xf32>
    %5 = arith.addf %2, %4 : vector<16x128xf32>
    %c0_5 = arith.constant 0 : index
    %c0_6 = arith.constant 0 : index
    %6 = vector.load %arg2[%c0_5, %c0_6] : memref<16x128xf32, #tpu.memory_space<vmem>>, vector<16x128xf32>
    %cst_7 = arith.constant dense<0.000000e+00> : vector<16x128xf32>
    %7 = tpu.matmul %0, %6, %cst_7 {dimension_numbers = #tpu.dot_dimension_numbers<[1], [0], [0], [1], [0, 0, 1, 1], [], []>} : vector<16x16xf32>, vector<16x128xf32>, vector<16x128xf32> -> vector<16x128xf32>
    %c0_8 = arith.constant 0 : index
    %c0_9 = arith.constant 0 : index
    %8 = vector.load %arg6[%c0_8, %c0_9] : memref<1x128xf32, #tpu.memory_space<vmem>>, vector<1x128xf32>
    %9 = vector.broadcast %8 : vector<1x128xf32> to vector<16x128xf32>
    %10 = arith.addf %7, %9 : vector<16x128xf32>
    %c0_10 = arith.constant 0 : index
    %c0_11 = arith.constant 0 : index
    %11 = vector.load %arg3[%c0_10, %c0_11] : memref<32x128xf32, #tpu.memory_space<vmem>>, vector<32x128xf32>
    %c0_12 = arith.constant 0 : index
    %c0_13 = arith.constant 0 : index
    %12 = vector.load %arg4[%c0_12, %c0_13] : memref<32x128xf32, #tpu.memory_space<vmem>>, vector<32x128xf32>
    %cst_14 = arith.constant 0.000000e+00 : f32
    %13 = vector.broadcast %cst_14 : f32 to vector<2x32xf32>
    %cst_15 = arith.constant 0.000000e+00 : f32
    %14 = vector.broadcast %cst_15 : f32 to vector<2x32xf32>
    %15 = vector.extract_strided_slice %5 {offsets = [0, 0], sizes = [2, 128], strides = [1, 1]} : vector<16x128xf32> to vector<2x128xf32>
    %16 = vector.extract_strided_slice %10 {offsets = [14, 0], sizes = [2, 128], strides = [1, 1]} : vector<16x128xf32> to vector<2x128xf32>
    %17 = vector.extract_strided_slice %15 {offsets = [0, 0], sizes = [2, 32], strides = [1, 1]} : vector<2x128xf32> to vector<2x32xf32>
    %18 = arith.negf %17 : vector<2x32xf32>
    %19 = math.exp %18 : vector<2x32xf32>
    %cst_16 = arith.constant 1.000000e+00 : f32
    %20 = vector.broadcast %cst_16 : f32 to vector<2x32xf32>
    %21 = arith.addf %20, %19 : vector<2x32xf32>
    %22 = arith.divf %20, %21 : vector<2x32xf32>
    %23 = vector.extract_strided_slice %15 {offsets = [0, 32], sizes = [2, 32], strides = [1, 1]} : vector<2x128xf32> to vector<2x32xf32>
    %24 = arith.negf %23 : vector<2x32xf32>
    %25 = math.exp %24 : vector<2x32xf32>
    %cst_17 = arith.constant 1.000000e+00 : f32
    %26 = vector.broadcast %cst_17 : f32 to vector<2x32xf32>
    %27 = arith.addf %26, %25 : vector<2x32xf32>
    %28 = arith.divf %26, %27 : vector<2x32xf32>
    %29 = vector.extract_strided_slice %15 {offsets = [0, 64], sizes = [2, 32], strides = [1, 1]} : vector<2x128xf32> to vector<2x32xf32>
    %30 = math.tanh %29 : vector<2x32xf32>
    %31 = vector.extract_strided_slice %15 {offsets = [0, 96], sizes = [2, 32], strides = [1, 1]} : vector<2x128xf32> to vector<2x32xf32>
    %32 = arith.negf %31 : vector<2x32xf32>
    %33 = math.exp %32 : vector<2x32xf32>
    %cst_18 = arith.constant 1.000000e+00 : f32
    %34 = vector.broadcast %cst_18 : f32 to vector<2x32xf32>
    %35 = arith.addf %34, %33 : vector<2x32xf32>
    %36 = arith.divf %34, %35 : vector<2x32xf32>
    %37 = arith.mulf %28, %13 : vector<2x32xf32>
    %38 = arith.mulf %22, %30 : vector<2x32xf32>
    %39 = arith.addf %37, %38 : vector<2x32xf32>
    %40 = math.tanh %39 : vector<2x32xf32>
    %41 = arith.mulf %36, %40 : vector<2x32xf32>
    %42 = vector.extract_strided_slice %16 {offsets = [0, 0], sizes = [2, 32], strides = [1, 1]} : vector<2x128xf32> to vector<2x32xf32>
    %43 = arith.negf %42 : vector<2x32xf32>
    %44 = math.exp %43 : vector<2x32xf32>
    %cst_19 = arith.constant 1.000000e+00 : f32
    %45 = vector.broadcast %cst_19 : f32 to vector<2x32xf32>
    %46 = arith.addf %45, %44 : vector<2x32xf32>
    %47 = arith.divf %45, %46 : vector<2x32xf32>
    %48 = vector.extract_strided_slice %16 {offsets = [0, 32], sizes = [2, 32], strides = [1, 1]} : vector<2x128xf32> to vector<2x32xf32>
    %49 = arith.negf %48 : vector<2x32xf32>
    %50 = math.exp %49 : vector<2x32xf32>
    %cst_20 = arith.constant 1.000000e+00 : f32
    %51 = vector.broadcast %cst_20 : f32 to vector<2x32xf32>
    %52 = arith.addf %51, %50 : vector<2x32xf32>
    %53 = arith.divf %51, %52 : vector<2x32xf32>
    %54 = vector.extract_strided_slice %16 {offsets = [0, 64], sizes = [2, 32], strides = [1, 1]} : vector<2x128xf32> to vector<2x32xf32>
    %55 = math.tanh %54 : vector<2x32xf32>
    %56 = vector.extract_strided_slice %16 {offsets = [0, 96], sizes = [2, 32], strides = [1, 1]} : vector<2x128xf32> to vector<2x32xf32>
    %57 = arith.negf %56 : vector<2x32xf32>
    %58 = math.exp %57 : vector<2x32xf32>
    %cst_21 = arith.constant 1.000000e+00 : f32
    %59 = vector.broadcast %cst_21 : f32 to vector<2x32xf32>
    %60 = arith.addf %59, %58 : vector<2x32xf32>
    %61 = arith.divf %59, %60 : vector<2x32xf32>
    %62 = arith.mulf %53, %14 : vector<2x32xf32>
    %63 = arith.mulf %47, %55 : vector<2x32xf32>
    %64 = arith.addf %62, %63 : vector<2x32xf32>
    %65 = math.tanh %64 : vector<2x32xf32>
    %66 = arith.mulf %61, %65 : vector<2x32xf32>
    %cst_22 = arith.constant dense<0.000000e+00> : vector<2x128xf32>
    %67 = tpu.matmul %41, %11, %cst_22 {dimension_numbers = #tpu.dot_dimension_numbers<[1], [0], [0], [1], [0, 0, 1, 1], [], []>} : vector<2x32xf32>, vector<32x128xf32>, vector<2x128xf32> -> vector<2x128xf32>
    %68 = vector.extract_strided_slice %5 {offsets = [2, 0], sizes = [2, 128], strides = [1, 1]} : vector<16x128xf32> to vector<2x128xf32>
    %69 = arith.addf %67, %68 : vector<2x128xf32>
    %cst_23 = arith.constant dense<0.000000e+00> : vector<2x128xf32>
    %70 = tpu.matmul %66, %12, %cst_23 {dimension_numbers = #tpu.dot_dimension_numbers<[1], [0], [0], [1], [0, 0, 1, 1], [], []>} : vector<2x32xf32>, vector<32x128xf32>, vector<2x128xf32> -> vector<2x128xf32>
    %71 = vector.extract_strided_slice %10 {offsets = [12, 0], sizes = [2, 128], strides = [1, 1]} : vector<16x128xf32> to vector<2x128xf32>
    %72 = arith.addf %70, %71 : vector<2x128xf32>
    %73 = vector.extract_strided_slice %69 {offsets = [0, 0], sizes = [2, 32], strides = [1, 1]} : vector<2x128xf32> to vector<2x32xf32>
    %74 = arith.negf %73 : vector<2x32xf32>
    %75 = math.exp %74 : vector<2x32xf32>
    %cst_24 = arith.constant 1.000000e+00 : f32
    %76 = vector.broadcast %cst_24 : f32 to vector<2x32xf32>
    %77 = arith.addf %76, %75 : vector<2x32xf32>
    %78 = arith.divf %76, %77 : vector<2x32xf32>
    %79 = vector.extract_strided_slice %69 {offsets = [0, 32], sizes = [2, 32], strides = [1, 1]} : vector<2x128xf32> to vector<2x32xf32>
    %80 = arith.negf %79 : vector<2x32xf32>
    %81 = math.exp %80 : vector<2x32xf32>
    %cst_25 = arith.constant 1.000000e+00 : f32
    %82 = vector.broadcast %cst_25 : f32 to vector<2x32xf32>
    %83 = arith.addf %82, %81 : vector<2x32xf32>
    %84 = arith.divf %82, %83 : vector<2x32xf32>
    %85 = vector.extract_strided_slice %69 {offsets = [0, 64], sizes = [2, 32], strides = [1, 1]} : vector<2x128xf32> to vector<2x32xf32>
    %86 = math.tanh %85 : vector<2x32xf32>
    %87 = vector.extract_strided_slice %69 {offsets = [0, 96], sizes = [2, 32], strides = [1, 1]} : vector<2x128xf32> to vector<2x32xf32>
    %88 = arith.negf %87 : vector<2x32xf32>
    %89 = math.exp %88 : vector<2x32xf32>
    %cst_26 = arith.constant 1.000000e+00 : f32
    %90 = vector.broadcast %cst_26 : f32 to vector<2x32xf32>
    %91 = arith.addf %90, %89 : vector<2x32xf32>
    %92 = arith.divf %90, %91 : vector<2x32xf32>
    %93 = arith.mulf %84, %39 : vector<2x32xf32>
    %94 = arith.mulf %78, %86 : vector<2x32xf32>
    %95 = arith.addf %93, %94 : vector<2x32xf32>
    %96 = math.tanh %95 : vector<2x32xf32>
    %97 = arith.mulf %92, %96 : vector<2x32xf32>
    %98 = vector.extract_strided_slice %72 {offsets = [0, 0], sizes = [2, 32], strides = [1, 1]} : vector<2x128xf32> to vector<2x32xf32>
    %99 = arith.negf %98 : vector<2x32xf32>
    %100 = math.exp %99 : vector<2x32xf32>
    %cst_27 = arith.constant 1.000000e+00 : f32
    %101 = vector.broadcast %cst_27 : f32 to vector<2x32xf32>
    %102 = arith.addf %101, %100 : vector<2x32xf32>
    %103 = arith.divf %101, %102 : vector<2x32xf32>
    %104 = vector.extract_strided_slice %72 {offsets = [0, 32], sizes = [2, 32], strides = [1, 1]} : vector<2x128xf32> to vector<2x32xf32>
    %105 = arith.negf %104 : vector<2x32xf32>
    %106 = math.exp %105 : vector<2x32xf32>
    %cst_28 = arith.constant 1.000000e+00 : f32
    %107 = vector.broadcast %cst_28 : f32 to vector<2x32xf32>
    %108 = arith.addf %107, %106 : vector<2x32xf32>
    %109 = arith.divf %107, %108 : vector<2x32xf32>
    %110 = vector.extract_strided_slice %72 {offsets = [0, 64], sizes = [2, 32], strides = [1, 1]} : vector<2x128xf32> to vector<2x32xf32>
    %111 = math.tanh %110 : vector<2x32xf32>
    %112 = vector.extract_strided_slice %72 {offsets = [0, 96], sizes = [2, 32], strides = [1, 1]} : vector<2x128xf32> to vector<2x32xf32>
    %113 = arith.negf %112 : vector<2x32xf32>
    %114 = math.exp %113 : vector<2x32xf32>
    %cst_29 = arith.constant 1.000000e+00 : f32
    %115 = vector.broadcast %cst_29 : f32 to vector<2x32xf32>
    %116 = arith.addf %115, %114 : vector<2x32xf32>
    %117 = arith.divf %115, %116 : vector<2x32xf32>
    %118 = arith.mulf %109, %64 : vector<2x32xf32>
    %119 = arith.mulf %103, %111 : vector<2x32xf32>
    %120 = arith.addf %118, %119 : vector<2x32xf32>
    %121 = math.tanh %120 : vector<2x32xf32>
    %122 = arith.mulf %117, %121 : vector<2x32xf32>
    %cst_30 = arith.constant dense<0.000000e+00> : vector<2x128xf32>
    %123 = tpu.matmul %97, %11, %cst_30 {dimension_numbers = #tpu.dot_dimension_numbers<[1], [0], [0], [1], [0, 0, 1, 1], [], []>} : vector<2x32xf32>, vector<32x128xf32>, vector<2x128xf32> -> vector<2x128xf32>
    %124 = vector.extract_strided_slice %5 {offsets = [4, 0], sizes = [2, 128], strides = [1, 1]} : vector<16x128xf32> to vector<2x128xf32>
    %125 = arith.addf %123, %124 : vector<2x128xf32>
    %cst_31 = arith.constant dense<0.000000e+00> : vector<2x128xf32>
    %126 = tpu.matmul %122, %12, %cst_31 {dimension_numbers = #tpu.dot_dimension_numbers<[1], [0], [0], [1], [0, 0, 1, 1], [], []>} : vector<2x32xf32>, vector<32x128xf32>, vector<2x128xf32> -> vector<2x128xf32>
    %127 = vector.extract_strided_slice %10 {offsets = [10, 0], sizes = [2, 128], strides = [1, 1]} : vector<16x128xf32> to vector<2x128xf32>
    %128 = arith.addf %126, %127 : vector<2x128xf32>
    %129 = vector.extract_strided_slice %125 {offsets = [0, 0], sizes = [2, 32], strides = [1, 1]} : vector<2x128xf32> to vector<2x32xf32>
    %130 = arith.negf %129 : vector<2x32xf32>
    %131 = math.exp %130 : vector<2x32xf32>
    %cst_32 = arith.constant 1.000000e+00 : f32
    %132 = vector.broadcast %cst_32 : f32 to vector<2x32xf32>
    %133 = arith.addf %132, %131 : vector<2x32xf32>
    %134 = arith.divf %132, %133 : vector<2x32xf32>
    %135 = vector.extract_strided_slice %125 {offsets = [0, 32], sizes = [2, 32], strides = [1, 1]} : vector<2x128xf32> to vector<2x32xf32>
    %136 = arith.negf %135 : vector<2x32xf32>
    %137 = math.exp %136 : vector<2x32xf32>
    %cst_33 = arith.constant 1.000000e+00 : f32
    %138 = vector.broadcast %cst_33 : f32 to vector<2x32xf32>
    %139 = arith.addf %138, %137 : vector<2x32xf32>
    %140 = arith.divf %138, %139 : vector<2x32xf32>
    %141 = vector.extract_strided_slice %125 {offsets = [0, 64], sizes = [2, 32], strides = [1, 1]} : vector<2x128xf32> to vector<2x32xf32>
    %142 = math.tanh %141 : vector<2x32xf32>
    %143 = vector.extract_strided_slice %125 {offsets = [0, 96], sizes = [2, 32], strides = [1, 1]} : vector<2x128xf32> to vector<2x32xf32>
    %144 = arith.negf %143 : vector<2x32xf32>
    %145 = math.exp %144 : vector<2x32xf32>
    %cst_34 = arith.constant 1.000000e+00 : f32
    %146 = vector.broadcast %cst_34 : f32 to vector<2x32xf32>
    %147 = arith.addf %146, %145 : vector<2x32xf32>
    %148 = arith.divf %146, %147 : vector<2x32xf32>
    %149 = arith.mulf %140, %95 : vector<2x32xf32>
    %150 = arith.mulf %134, %142 : vector<2x32xf32>
    %151 = arith.addf %149, %150 : vector<2x32xf32>
    %152 = math.tanh %151 : vector<2x32xf32>
    %153 = arith.mulf %148, %152 : vector<2x32xf32>
    %154 = vector.extract_strided_slice %128 {offsets = [0, 0], sizes = [2, 32], strides = [1, 1]} : vector<2x128xf32> to vector<2x32xf32>
    %155 = arith.negf %154 : vector<2x32xf32>
    %156 = math.exp %155 : vector<2x32xf32>
    %cst_35 = arith.constant 1.000000e+00 : f32
    %157 = vector.broadcast %cst_35 : f32 to vector<2x32xf32>
    %158 = arith.addf %157, %156 : vector<2x32xf32>
    %159 = arith.divf %157, %158 : vector<2x32xf32>
    %160 = vector.extract_strided_slice %128 {offsets = [0, 32], sizes = [2, 32], strides = [1, 1]} : vector<2x128xf32> to vector<2x32xf32>
    %161 = arith.negf %160 : vector<2x32xf32>
    %162 = math.exp %161 : vector<2x32xf32>
    %cst_36 = arith.constant 1.000000e+00 : f32
    %163 = vector.broadcast %cst_36 : f32 to vector<2x32xf32>
    %164 = arith.addf %163, %162 : vector<2x32xf32>
    %165 = arith.divf %163, %164 : vector<2x32xf32>
    %166 = vector.extract_strided_slice %128 {offsets = [0, 64], sizes = [2, 32], strides = [1, 1]} : vector<2x128xf32> to vector<2x32xf32>
    %167 = math.tanh %166 : vector<2x32xf32>
    %168 = vector.extract_strided_slice %128 {offsets = [0, 96], sizes = [2, 32], strides = [1, 1]} : vector<2x128xf32> to vector<2x32xf32>
    %169 = arith.negf %168 : vector<2x32xf32>
    %170 = math.exp %169 : vector<2x32xf32>
    %cst_37 = arith.constant 1.000000e+00 : f32
    %171 = vector.broadcast %cst_37 : f32 to vector<2x32xf32>
    %172 = arith.addf %171, %170 : vector<2x32xf32>
    %173 = arith.divf %171, %172 : vector<2x32xf32>
    %174 = arith.mulf %165, %120 : vector<2x32xf32>
    %175 = arith.mulf %159, %167 : vector<2x32xf32>
    %176 = arith.addf %174, %175 : vector<2x32xf32>
    %177 = math.tanh %176 : vector<2x32xf32>
    %178 = arith.mulf %173, %177 : vector<2x32xf32>
    %cst_38 = arith.constant dense<0.000000e+00> : vector<2x128xf32>
    %179 = tpu.matmul %153, %11, %cst_38 {dimension_numbers = #tpu.dot_dimension_numbers<[1], [0], [0], [1], [0, 0, 1, 1], [], []>} : vector<2x32xf32>, vector<32x128xf32>, vector<2x128xf32> -> vector<2x128xf32>
    %180 = vector.extract_strided_slice %5 {offsets = [6, 0], sizes = [2, 128], strides = [1, 1]} : vector<16x128xf32> to vector<2x128xf32>
    %181 = arith.addf %179, %180 : vector<2x128xf32>
    %cst_39 = arith.constant dense<0.000000e+00> : vector<2x128xf32>
    %182 = tpu.matmul %178, %12, %cst_39 {dimension_numbers = #tpu.dot_dimension_numbers<[1], [0], [0], [1], [0, 0, 1, 1], [], []>} : vector<2x32xf32>, vector<32x128xf32>, vector<2x128xf32> -> vector<2x128xf32>
    %183 = vector.extract_strided_slice %10 {offsets = [8, 0], sizes = [2, 128], strides = [1, 1]} : vector<16x128xf32> to vector<2x128xf32>
    %184 = arith.addf %182, %183 : vector<2x128xf32>
    %185 = vector.extract_strided_slice %181 {offsets = [0, 0], sizes = [2, 32], strides = [1, 1]} : vector<2x128xf32> to vector<2x32xf32>
    %186 = arith.negf %185 : vector<2x32xf32>
    %187 = math.exp %186 : vector<2x32xf32>
    %cst_40 = arith.constant 1.000000e+00 : f32
    %188 = vector.broadcast %cst_40 : f32 to vector<2x32xf32>
    %189 = arith.addf %188, %187 : vector<2x32xf32>
    %190 = arith.divf %188, %189 : vector<2x32xf32>
    %191 = vector.extract_strided_slice %181 {offsets = [0, 32], sizes = [2, 32], strides = [1, 1]} : vector<2x128xf32> to vector<2x32xf32>
    %192 = arith.negf %191 : vector<2x32xf32>
    %193 = math.exp %192 : vector<2x32xf32>
    %cst_41 = arith.constant 1.000000e+00 : f32
    %194 = vector.broadcast %cst_41 : f32 to vector<2x32xf32>
    %195 = arith.addf %194, %193 : vector<2x32xf32>
    %196 = arith.divf %194, %195 : vector<2x32xf32>
    %197 = vector.extract_strided_slice %181 {offsets = [0, 64], sizes = [2, 32], strides = [1, 1]} : vector<2x128xf32> to vector<2x32xf32>
    %198 = math.tanh %197 : vector<2x32xf32>
    %199 = vector.extract_strided_slice %181 {offsets = [0, 96], sizes = [2, 32], strides = [1, 1]} : vector<2x128xf32> to vector<2x32xf32>
    %200 = arith.negf %199 : vector<2x32xf32>
    %201 = math.exp %200 : vector<2x32xf32>
    %cst_42 = arith.constant 1.000000e+00 : f32
    %202 = vector.broadcast %cst_42 : f32 to vector<2x32xf32>
    %203 = arith.addf %202, %201 : vector<2x32xf32>
    %204 = arith.divf %202, %203 : vector<2x32xf32>
    %205 = arith.mulf %196, %151 : vector<2x32xf32>
    %206 = arith.mulf %190, %198 : vector<2x32xf32>
    %207 = arith.addf %205, %206 : vector<2x32xf32>
    %208 = math.tanh %207 : vector<2x32xf32>
    %209 = arith.mulf %204, %208 : vector<2x32xf32>
    %210 = vector.extract_strided_slice %184 {offsets = [0, 0], sizes = [2, 32], strides = [1, 1]} : vector<2x128xf32> to vector<2x32xf32>
    %211 = arith.negf %210 : vector<2x32xf32>
    %212 = math.exp %211 : vector<2x32xf32>
    %cst_43 = arith.constant 1.000000e+00 : f32
    %213 = vector.broadcast %cst_43 : f32 to vector<2x32xf32>
    %214 = arith.addf %213, %212 : vector<2x32xf32>
    %215 = arith.divf %213, %214 : vector<2x32xf32>
    %216 = vector.extract_strided_slice %184 {offsets = [0, 32], sizes = [2, 32], strides = [1, 1]} : vector<2x128xf32> to vector<2x32xf32>
    %217 = arith.negf %216 : vector<2x32xf32>
    %218 = math.exp %217 : vector<2x32xf32>
    %cst_44 = arith.constant 1.000000e+00 : f32
    %219 = vector.broadcast %cst_44 : f32 to vector<2x32xf32>
    %220 = arith.addf %219, %218 : vector<2x32xf32>
    %221 = arith.divf %219, %220 : vector<2x32xf32>
    %222 = vector.extract_strided_slice %184 {offsets = [0, 64], sizes = [2, 32], strides = [1, 1]} : vector<2x128xf32> to vector<2x32xf32>
    %223 = math.tanh %222 : vector<2x32xf32>
    %224 = vector.extract_strided_slice %184 {offsets = [0, 96], sizes = [2, 32], strides = [1, 1]} : vector<2x128xf32> to vector<2x32xf32>
    %225 = arith.negf %224 : vector<2x32xf32>
    %226 = math.exp %225 : vector<2x32xf32>
    %cst_45 = arith.constant 1.000000e+00 : f32
    %227 = vector.broadcast %cst_45 : f32 to vector<2x32xf32>
    %228 = arith.addf %227, %226 : vector<2x32xf32>
    %229 = arith.divf %227, %228 : vector<2x32xf32>
    %230 = arith.mulf %221, %176 : vector<2x32xf32>
    %231 = arith.mulf %215, %223 : vector<2x32xf32>
    %232 = arith.addf %230, %231 : vector<2x32xf32>
    %233 = math.tanh %232 : vector<2x32xf32>
    %234 = arith.mulf %229, %233 : vector<2x32xf32>
    %cst_46 = arith.constant dense<0.000000e+00> : vector<2x128xf32>
    %235 = tpu.matmul %209, %11, %cst_46 {dimension_numbers = #tpu.dot_dimension_numbers<[1], [0], [0], [1], [0, 0, 1, 1], [], []>} : vector<2x32xf32>, vector<32x128xf32>, vector<2x128xf32> -> vector<2x128xf32>
    %236 = vector.extract_strided_slice %5 {offsets = [8, 0], sizes = [2, 128], strides = [1, 1]} : vector<16x128xf32> to vector<2x128xf32>
    %237 = arith.addf %235, %236 : vector<2x128xf32>
    %cst_47 = arith.constant dense<0.000000e+00> : vector<2x128xf32>
    %238 = tpu.matmul %234, %12, %cst_47 {dimension_numbers = #tpu.dot_dimension_numbers<[1], [0], [0], [1], [0, 0, 1, 1], [], []>} : vector<2x32xf32>, vector<32x128xf32>, vector<2x128xf32> -> vector<2x128xf32>
    %239 = vector.extract_strided_slice %10 {offsets = [6, 0], sizes = [2, 128], strides = [1, 1]} : vector<16x128xf32> to vector<2x128xf32>
    %240 = arith.addf %238, %239 : vector<2x128xf32>
    %241 = vector.extract_strided_slice %237 {offsets = [0, 0], sizes = [2, 32], strides = [1, 1]} : vector<2x128xf32> to vector<2x32xf32>
    %242 = arith.negf %241 : vector<2x32xf32>
    %243 = math.exp %242 : vector<2x32xf32>
    %cst_48 = arith.constant 1.000000e+00 : f32
    %244 = vector.broadcast %cst_48 : f32 to vector<2x32xf32>
    %245 = arith.addf %244, %243 : vector<2x32xf32>
    %246 = arith.divf %244, %245 : vector<2x32xf32>
    %247 = vector.extract_strided_slice %237 {offsets = [0, 32], sizes = [2, 32], strides = [1, 1]} : vector<2x128xf32> to vector<2x32xf32>
    %248 = arith.negf %247 : vector<2x32xf32>
    %249 = math.exp %248 : vector<2x32xf32>
    %cst_49 = arith.constant 1.000000e+00 : f32
    %250 = vector.broadcast %cst_49 : f32 to vector<2x32xf32>
    %251 = arith.addf %250, %249 : vector<2x32xf32>
    %252 = arith.divf %250, %251 : vector<2x32xf32>
    %253 = vector.extract_strided_slice %237 {offsets = [0, 64], sizes = [2, 32], strides = [1, 1]} : vector<2x128xf32> to vector<2x32xf32>
    %254 = math.tanh %253 : vector<2x32xf32>
    %255 = vector.extract_strided_slice %237 {offsets = [0, 96], sizes = [2, 32], strides = [1, 1]} : vector<2x128xf32> to vector<2x32xf32>
    %256 = arith.negf %255 : vector<2x32xf32>
    %257 = math.exp %256 : vector<2x32xf32>
    %cst_50 = arith.constant 1.000000e+00 : f32
    %258 = vector.broadcast %cst_50 : f32 to vector<2x32xf32>
    %259 = arith.addf %258, %257 : vector<2x32xf32>
    %260 = arith.divf %258, %259 : vector<2x32xf32>
    %261 = arith.mulf %252, %207 : vector<2x32xf32>
    %262 = arith.mulf %246, %254 : vector<2x32xf32>
    %263 = arith.addf %261, %262 : vector<2x32xf32>
    %264 = math.tanh %263 : vector<2x32xf32>
    %265 = arith.mulf %260, %264 : vector<2x32xf32>
    %266 = vector.extract_strided_slice %240 {offsets = [0, 0], sizes = [2, 32], strides = [1, 1]} : vector<2x128xf32> to vector<2x32xf32>
    %267 = arith.negf %266 : vector<2x32xf32>
    %268 = math.exp %267 : vector<2x32xf32>
    %cst_51 = arith.constant 1.000000e+00 : f32
    %269 = vector.broadcast %cst_51 : f32 to vector<2x32xf32>
    %270 = arith.addf %269, %268 : vector<2x32xf32>
    %271 = arith.divf %269, %270 : vector<2x32xf32>
    %272 = vector.extract_strided_slice %240 {offsets = [0, 32], sizes = [2, 32], strides = [1, 1]} : vector<2x128xf32> to vector<2x32xf32>
    %273 = arith.negf %272 : vector<2x32xf32>
    %274 = math.exp %273 : vector<2x32xf32>
    %cst_52 = arith.constant 1.000000e+00 : f32
    %275 = vector.broadcast %cst_52 : f32 to vector<2x32xf32>
    %276 = arith.addf %275, %274 : vector<2x32xf32>
    %277 = arith.divf %275, %276 : vector<2x32xf32>
    %278 = vector.extract_strided_slice %240 {offsets = [0, 64], sizes = [2, 32], strides = [1, 1]} : vector<2x128xf32> to vector<2x32xf32>
    %279 = math.tanh %278 : vector<2x32xf32>
    %280 = vector.extract_strided_slice %240 {offsets = [0, 96], sizes = [2, 32], strides = [1, 1]} : vector<2x128xf32> to vector<2x32xf32>
    %281 = arith.negf %280 : vector<2x32xf32>
    %282 = math.exp %281 : vector<2x32xf32>
    %cst_53 = arith.constant 1.000000e+00 : f32
    %283 = vector.broadcast %cst_53 : f32 to vector<2x32xf32>
    %284 = arith.addf %283, %282 : vector<2x32xf32>
    %285 = arith.divf %283, %284 : vector<2x32xf32>
    %286 = arith.mulf %277, %232 : vector<2x32xf32>
    %287 = arith.mulf %271, %279 : vector<2x32xf32>
    %288 = arith.addf %286, %287 : vector<2x32xf32>
    %289 = math.tanh %288 : vector<2x32xf32>
    %290 = arith.mulf %285, %289 : vector<2x32xf32>
    %cst_54 = arith.constant dense<0.000000e+00> : vector<2x128xf32>
    %291 = tpu.matmul %265, %11, %cst_54 {dimension_numbers = #tpu.dot_dimension_numbers<[1], [0], [0], [1], [0, 0, 1, 1], [], []>} : vector<2x32xf32>, vector<32x128xf32>, vector<2x128xf32> -> vector<2x128xf32>
    %292 = vector.extract_strided_slice %5 {offsets = [10, 0], sizes = [2, 128], strides = [1, 1]} : vector<16x128xf32> to vector<2x128xf32>
    %293 = arith.addf %291, %292 : vector<2x128xf32>
    %cst_55 = arith.constant dense<0.000000e+00> : vector<2x128xf32>
    %294 = tpu.matmul %290, %12, %cst_55 {dimension_numbers = #tpu.dot_dimension_numbers<[1], [0], [0], [1], [0, 0, 1, 1], [], []>} : vector<2x32xf32>, vector<32x128xf32>, vector<2x128xf32> -> vector<2x128xf32>
    %295 = vector.extract_strided_slice %10 {offsets = [4, 0], sizes = [2, 128], strides = [1, 1]} : vector<16x128xf32> to vector<2x128xf32>
    %296 = arith.addf %294, %295 : vector<2x128xf32>
    %297 = vector.extract_strided_slice %293 {offsets = [0, 0], sizes = [2, 32], strides = [1, 1]} : vector<2x128xf32> to vector<2x32xf32>
    %298 = arith.negf %297 : vector<2x32xf32>
    %299 = math.exp %298 : vector<2x32xf32>
    %cst_56 = arith.constant 1.000000e+00 : f32
    %300 = vector.broadcast %cst_56 : f32 to vector<2x32xf32>
    %301 = arith.addf %300, %299 : vector<2x32xf32>
    %302 = arith.divf %300, %301 : vector<2x32xf32>
    %303 = vector.extract_strided_slice %293 {offsets = [0, 32], sizes = [2, 32], strides = [1, 1]} : vector<2x128xf32> to vector<2x32xf32>
    %304 = arith.negf %303 : vector<2x32xf32>
    %305 = math.exp %304 : vector<2x32xf32>
    %cst_57 = arith.constant 1.000000e+00 : f32
    %306 = vector.broadcast %cst_57 : f32 to vector<2x32xf32>
    %307 = arith.addf %306, %305 : vector<2x32xf32>
    %308 = arith.divf %306, %307 : vector<2x32xf32>
    %309 = vector.extract_strided_slice %293 {offsets = [0, 64], sizes = [2, 32], strides = [1, 1]} : vector<2x128xf32> to vector<2x32xf32>
    %310 = math.tanh %309 : vector<2x32xf32>
    %311 = vector.extract_strided_slice %293 {offsets = [0, 96], sizes = [2, 32], strides = [1, 1]} : vector<2x128xf32> to vector<2x32xf32>
    %312 = arith.negf %311 : vector<2x32xf32>
    %313 = math.exp %312 : vector<2x32xf32>
    %cst_58 = arith.constant 1.000000e+00 : f32
    %314 = vector.broadcast %cst_58 : f32 to vector<2x32xf32>
    %315 = arith.addf %314, %313 : vector<2x32xf32>
    %316 = arith.divf %314, %315 : vector<2x32xf32>
    %317 = arith.mulf %308, %263 : vector<2x32xf32>
    %318 = arith.mulf %302, %310 : vector<2x32xf32>
    %319 = arith.addf %317, %318 : vector<2x32xf32>
    %320 = math.tanh %319 : vector<2x32xf32>
    %321 = arith.mulf %316, %320 : vector<2x32xf32>
    %322 = vector.extract_strided_slice %296 {offsets = [0, 0], sizes = [2, 32], strides = [1, 1]} : vector<2x128xf32> to vector<2x32xf32>
    %323 = arith.negf %322 : vector<2x32xf32>
    %324 = math.exp %323 : vector<2x32xf32>
    %cst_59 = arith.constant 1.000000e+00 : f32
    %325 = vector.broadcast %cst_59 : f32 to vector<2x32xf32>
    %326 = arith.addf %325, %324 : vector<2x32xf32>
    %327 = arith.divf %325, %326 : vector<2x32xf32>
    %328 = vector.extract_strided_slice %296 {offsets = [0, 32], sizes = [2, 32], strides = [1, 1]} : vector<2x128xf32> to vector<2x32xf32>
    %329 = arith.negf %328 : vector<2x32xf32>
    %330 = math.exp %329 : vector<2x32xf32>
    %cst_60 = arith.constant 1.000000e+00 : f32
    %331 = vector.broadcast %cst_60 : f32 to vector<2x32xf32>
    %332 = arith.addf %331, %330 : vector<2x32xf32>
    %333 = arith.divf %331, %332 : vector<2x32xf32>
    %334 = vector.extract_strided_slice %296 {offsets = [0, 64], sizes = [2, 32], strides = [1, 1]} : vector<2x128xf32> to vector<2x32xf32>
    %335 = math.tanh %334 : vector<2x32xf32>
    %336 = vector.extract_strided_slice %296 {offsets = [0, 96], sizes = [2, 32], strides = [1, 1]} : vector<2x128xf32> to vector<2x32xf32>
    %337 = arith.negf %336 : vector<2x32xf32>
    %338 = math.exp %337 : vector<2x32xf32>
    %cst_61 = arith.constant 1.000000e+00 : f32
    %339 = vector.broadcast %cst_61 : f32 to vector<2x32xf32>
    %340 = arith.addf %339, %338 : vector<2x32xf32>
    %341 = arith.divf %339, %340 : vector<2x32xf32>
    %342 = arith.mulf %333, %288 : vector<2x32xf32>
    %343 = arith.mulf %327, %335 : vector<2x32xf32>
    %344 = arith.addf %342, %343 : vector<2x32xf32>
    %345 = math.tanh %344 : vector<2x32xf32>
    %346 = arith.mulf %341, %345 : vector<2x32xf32>
    %cst_62 = arith.constant dense<0.000000e+00> : vector<2x128xf32>
    %347 = tpu.matmul %321, %11, %cst_62 {dimension_numbers = #tpu.dot_dimension_numbers<[1], [0], [0], [1], [0, 0, 1, 1], [], []>} : vector<2x32xf32>, vector<32x128xf32>, vector<2x128xf32> -> vector<2x128xf32>
    %348 = vector.extract_strided_slice %5 {offsets = [12, 0], sizes = [2, 128], strides = [1, 1]} : vector<16x128xf32> to vector<2x128xf32>
    %349 = arith.addf %347, %348 : vector<2x128xf32>
    %cst_63 = arith.constant dense<0.000000e+00> : vector<2x128xf32>
    %350 = tpu.matmul %346, %12, %cst_63 {dimension_numbers = #tpu.dot_dimension_numbers<[1], [0], [0], [1], [0, 0, 1, 1], [], []>} : vector<2x32xf32>, vector<32x128xf32>, vector<2x128xf32> -> vector<2x128xf32>
    %351 = vector.extract_strided_slice %10 {offsets = [2, 0], sizes = [2, 128], strides = [1, 1]} : vector<16x128xf32> to vector<2x128xf32>
    %352 = arith.addf %350, %351 : vector<2x128xf32>
    %353 = vector.extract_strided_slice %349 {offsets = [0, 0], sizes = [2, 32], strides = [1, 1]} : vector<2x128xf32> to vector<2x32xf32>
    %354 = arith.negf %353 : vector<2x32xf32>
    %355 = math.exp %354 : vector<2x32xf32>
    %cst_64 = arith.constant 1.000000e+00 : f32
    %356 = vector.broadcast %cst_64 : f32 to vector<2x32xf32>
    %357 = arith.addf %356, %355 : vector<2x32xf32>
    %358 = arith.divf %356, %357 : vector<2x32xf32>
    %359 = vector.extract_strided_slice %349 {offsets = [0, 32], sizes = [2, 32], strides = [1, 1]} : vector<2x128xf32> to vector<2x32xf32>
    %360 = arith.negf %359 : vector<2x32xf32>
    %361 = math.exp %360 : vector<2x32xf32>
    %cst_65 = arith.constant 1.000000e+00 : f32
    %362 = vector.broadcast %cst_65 : f32 to vector<2x32xf32>
    %363 = arith.addf %362, %361 : vector<2x32xf32>
    %364 = arith.divf %362, %363 : vector<2x32xf32>
    %365 = vector.extract_strided_slice %349 {offsets = [0, 64], sizes = [2, 32], strides = [1, 1]} : vector<2x128xf32> to vector<2x32xf32>
    %366 = math.tanh %365 : vector<2x32xf32>
    %367 = vector.extract_strided_slice %349 {offsets = [0, 96], sizes = [2, 32], strides = [1, 1]} : vector<2x128xf32> to vector<2x32xf32>
    %368 = arith.negf %367 : vector<2x32xf32>
    %369 = math.exp %368 : vector<2x32xf32>
    %cst_66 = arith.constant 1.000000e+00 : f32
    %370 = vector.broadcast %cst_66 : f32 to vector<2x32xf32>
    %371 = arith.addf %370, %369 : vector<2x32xf32>
    %372 = arith.divf %370, %371 : vector<2x32xf32>
    %373 = arith.mulf %364, %319 : vector<2x32xf32>
    %374 = arith.mulf %358, %366 : vector<2x32xf32>
    %375 = arith.addf %373, %374 : vector<2x32xf32>
    %376 = math.tanh %375 : vector<2x32xf32>
    %377 = arith.mulf %372, %376 : vector<2x32xf32>
    %378 = vector.extract_strided_slice %352 {offsets = [0, 0], sizes = [2, 32], strides = [1, 1]} : vector<2x128xf32> to vector<2x32xf32>
    %379 = arith.negf %378 : vector<2x32xf32>
    %380 = math.exp %379 : vector<2x32xf32>
    %cst_67 = arith.constant 1.000000e+00 : f32
    %381 = vector.broadcast %cst_67 : f32 to vector<2x32xf32>
    %382 = arith.addf %381, %380 : vector<2x32xf32>
    %383 = arith.divf %381, %382 : vector<2x32xf32>
    %384 = vector.extract_strided_slice %352 {offsets = [0, 32], sizes = [2, 32], strides = [1, 1]} : vector<2x128xf32> to vector<2x32xf32>
    %385 = arith.negf %384 : vector<2x32xf32>
    %386 = math.exp %385 : vector<2x32xf32>
    %cst_68 = arith.constant 1.000000e+00 : f32
    %387 = vector.broadcast %cst_68 : f32 to vector<2x32xf32>
    %388 = arith.addf %387, %386 : vector<2x32xf32>
    %389 = arith.divf %387, %388 : vector<2x32xf32>
    %390 = vector.extract_strided_slice %352 {offsets = [0, 64], sizes = [2, 32], strides = [1, 1]} : vector<2x128xf32> to vector<2x32xf32>
    %391 = math.tanh %390 : vector<2x32xf32>
    %392 = vector.extract_strided_slice %352 {offsets = [0, 96], sizes = [2, 32], strides = [1, 1]} : vector<2x128xf32> to vector<2x32xf32>
    %393 = arith.negf %392 : vector<2x32xf32>
    %394 = math.exp %393 : vector<2x32xf32>
    %cst_69 = arith.constant 1.000000e+00 : f32
    %395 = vector.broadcast %cst_69 : f32 to vector<2x32xf32>
    %396 = arith.addf %395, %394 : vector<2x32xf32>
    %397 = arith.divf %395, %396 : vector<2x32xf32>
    %398 = arith.mulf %389, %344 : vector<2x32xf32>
    %399 = arith.mulf %383, %391 : vector<2x32xf32>
    %400 = arith.addf %398, %399 : vector<2x32xf32>
    %401 = math.tanh %400 : vector<2x32xf32>
    %402 = arith.mulf %397, %401 : vector<2x32xf32>
    %cst_70 = arith.constant dense<0.000000e+00> : vector<2x128xf32>
    %403 = tpu.matmul %377, %11, %cst_70 {dimension_numbers = #tpu.dot_dimension_numbers<[1], [0], [0], [1], [0, 0, 1, 1], [], []>} : vector<2x32xf32>, vector<32x128xf32>, vector<2x128xf32> -> vector<2x128xf32>
    %404 = vector.extract_strided_slice %5 {offsets = [14, 0], sizes = [2, 128], strides = [1, 1]} : vector<16x128xf32> to vector<2x128xf32>
    %405 = arith.addf %403, %404 : vector<2x128xf32>
    %cst_71 = arith.constant dense<0.000000e+00> : vector<2x128xf32>
    %406 = tpu.matmul %402, %12, %cst_71 {dimension_numbers = #tpu.dot_dimension_numbers<[1], [0], [0], [1], [0, 0, 1, 1], [], []>} : vector<2x32xf32>, vector<32x128xf32>, vector<2x128xf32> -> vector<2x128xf32>
    %407 = vector.extract_strided_slice %10 {offsets = [0, 0], sizes = [2, 128], strides = [1, 1]} : vector<16x128xf32> to vector<2x128xf32>
    %408 = arith.addf %406, %407 : vector<2x128xf32>
    %409 = vector.extract_strided_slice %405 {offsets = [0, 0], sizes = [2, 32], strides = [1, 1]} : vector<2x128xf32> to vector<2x32xf32>
    %410 = arith.negf %409 : vector<2x32xf32>
    %411 = math.exp %410 : vector<2x32xf32>
    %cst_72 = arith.constant 1.000000e+00 : f32
    %412 = vector.broadcast %cst_72 : f32 to vector<2x32xf32>
    %413 = arith.addf %412, %411 : vector<2x32xf32>
    %414 = arith.divf %412, %413 : vector<2x32xf32>
    %415 = vector.extract_strided_slice %405 {offsets = [0, 32], sizes = [2, 32], strides = [1, 1]} : vector<2x128xf32> to vector<2x32xf32>
    %416 = arith.negf %415 : vector<2x32xf32>
    %417 = math.exp %416 : vector<2x32xf32>
    %cst_73 = arith.constant 1.000000e+00 : f32
    %418 = vector.broadcast %cst_73 : f32 to vector<2x32xf32>
    %419 = arith.addf %418, %417 : vector<2x32xf32>
    %420 = arith.divf %418, %419 : vector<2x32xf32>
    %421 = vector.extract_strided_slice %405 {offsets = [0, 64], sizes = [2, 32], strides = [1, 1]} : vector<2x128xf32> to vector<2x32xf32>
    %422 = math.tanh %421 : vector<2x32xf32>
    %423 = vector.extract_strided_slice %405 {offsets = [0, 96], sizes = [2, 32], strides = [1, 1]} : vector<2x128xf32> to vector<2x32xf32>
    %424 = arith.negf %423 : vector<2x32xf32>
    %425 = math.exp %424 : vector<2x32xf32>
    %cst_74 = arith.constant 1.000000e+00 : f32
    %426 = vector.broadcast %cst_74 : f32 to vector<2x32xf32>
    %427 = arith.addf %426, %425 : vector<2x32xf32>
    %428 = arith.divf %426, %427 : vector<2x32xf32>
    %429 = arith.mulf %420, %375 : vector<2x32xf32>
    %430 = arith.mulf %414, %422 : vector<2x32xf32>
    %431 = arith.addf %429, %430 : vector<2x32xf32>
    %432 = math.tanh %431 : vector<2x32xf32>
    %433 = arith.mulf %428, %432 : vector<2x32xf32>
    %434 = vector.extract_strided_slice %408 {offsets = [0, 0], sizes = [2, 32], strides = [1, 1]} : vector<2x128xf32> to vector<2x32xf32>
    %435 = arith.negf %434 : vector<2x32xf32>
    %436 = math.exp %435 : vector<2x32xf32>
    %cst_75 = arith.constant 1.000000e+00 : f32
    %437 = vector.broadcast %cst_75 : f32 to vector<2x32xf32>
    %438 = arith.addf %437, %436 : vector<2x32xf32>
    %439 = arith.divf %437, %438 : vector<2x32xf32>
    %440 = vector.extract_strided_slice %408 {offsets = [0, 32], sizes = [2, 32], strides = [1, 1]} : vector<2x128xf32> to vector<2x32xf32>
    %441 = arith.negf %440 : vector<2x32xf32>
    %442 = math.exp %441 : vector<2x32xf32>
    %cst_76 = arith.constant 1.000000e+00 : f32
    %443 = vector.broadcast %cst_76 : f32 to vector<2x32xf32>
    %444 = arith.addf %443, %442 : vector<2x32xf32>
    %445 = arith.divf %443, %444 : vector<2x32xf32>
    %446 = vector.extract_strided_slice %408 {offsets = [0, 64], sizes = [2, 32], strides = [1, 1]} : vector<2x128xf32> to vector<2x32xf32>
    %447 = math.tanh %446 : vector<2x32xf32>
    %448 = vector.extract_strided_slice %408 {offsets = [0, 96], sizes = [2, 32], strides = [1, 1]} : vector<2x128xf32> to vector<2x32xf32>
    %449 = arith.negf %448 : vector<2x32xf32>
    %450 = math.exp %449 : vector<2x32xf32>
    %cst_77 = arith.constant 1.000000e+00 : f32
    %451 = vector.broadcast %cst_77 : f32 to vector<2x32xf32>
    %452 = arith.addf %451, %450 : vector<2x32xf32>
    %453 = arith.divf %451, %452 : vector<2x32xf32>
    %454 = arith.mulf %445, %400 : vector<2x32xf32>
    %455 = arith.mulf %439, %447 : vector<2x32xf32>
    %456 = arith.addf %454, %455 : vector<2x32xf32>
    %457 = math.tanh %456 : vector<2x32xf32>
    %458 = arith.mulf %453, %457 : vector<2x32xf32>
    %459 = tpu.concatenate %41, %97, %153, %209, %265, %321, %377, %433 in 0 : vector<2x32xf32>, vector<2x32xf32>, vector<2x32xf32>, vector<2x32xf32>, vector<2x32xf32>, vector<2x32xf32>, vector<2x32xf32>, vector<2x32xf32> -> vector<16x32xf32>
    %460 = tpu.concatenate %458, %402, %346, %290, %234, %178, %122, %66 in 0 : vector<2x32xf32>, vector<2x32xf32>, vector<2x32xf32>, vector<2x32xf32>, vector<2x32xf32>, vector<2x32xf32>, vector<2x32xf32>, vector<2x32xf32> -> vector<16x32xf32>
    %461 = tpu.concatenate %459, %460 in 1 : vector<16x32xf32>, vector<16x32xf32> -> vector<16x64xf32>
    %c0_78 = arith.constant 0 : index
    %c0_79 = arith.constant 0 : index
    %462 = vector.load %arg7[%c0_78, %c0_79] : memref<64x128xf32, #tpu.memory_space<vmem>>, vector<64x128xf32>
    %cst_80 = arith.constant dense<0.000000e+00> : vector<16x128xf32>
    %463 = tpu.matmul %461, %462, %cst_80 {dimension_numbers = #tpu.dot_dimension_numbers<[1], [0], [0], [1], [0, 0, 1, 1], [], []>} : vector<16x64xf32>, vector<64x128xf32>, vector<16x128xf32> -> vector<16x128xf32>
    %c0_81 = arith.constant 0 : index
    %c0_82 = arith.constant 0 : index
    %464 = vector.load %arg11[%c0_81, %c0_82] : memref<1x128xf32, #tpu.memory_space<vmem>>, vector<1x128xf32>
    %465 = vector.broadcast %464 : vector<1x128xf32> to vector<16x128xf32>
    %466 = arith.addf %463, %465 : vector<16x128xf32>
    %c0_83 = arith.constant 0 : index
    %c0_84 = arith.constant 0 : index
    %467 = vector.load %arg8[%c0_83, %c0_84] : memref<64x128xf32, #tpu.memory_space<vmem>>, vector<64x128xf32>
    %cst_85 = arith.constant dense<0.000000e+00> : vector<16x128xf32>
    %468 = tpu.matmul %461, %467, %cst_85 {dimension_numbers = #tpu.dot_dimension_numbers<[1], [0], [0], [1], [0, 0, 1, 1], [], []>} : vector<16x64xf32>, vector<64x128xf32>, vector<16x128xf32> -> vector<16x128xf32>
    %c0_86 = arith.constant 0 : index
    %c0_87 = arith.constant 0 : index
    %469 = vector.load %arg12[%c0_86, %c0_87] : memref<1x128xf32, #tpu.memory_space<vmem>>, vector<1x128xf32>
    %470 = vector.broadcast %469 : vector<1x128xf32> to vector<16x128xf32>
    %471 = arith.addf %468, %470 : vector<16x128xf32>
    %c0_88 = arith.constant 0 : index
    %c0_89 = arith.constant 0 : index
    %472 = vector.load %arg9[%c0_88, %c0_89] : memref<32x128xf32, #tpu.memory_space<vmem>>, vector<32x128xf32>
    %cst_90 = arith.constant 0.000000e+00 : f32
    %473 = vector.broadcast %cst_90 : f32 to vector<2x32xf32>
    %cst_91 = arith.constant 0.000000e+00 : f32
    %474 = vector.broadcast %cst_91 : f32 to vector<2x32xf32>
    %475 = vector.extract_strided_slice %466 {offsets = [0, 0], sizes = [2, 128], strides = [1, 1]} : vector<16x128xf32> to vector<2x128xf32>
    %476 = vector.extract_strided_slice %471 {offsets = [14, 0], sizes = [2, 128], strides = [1, 1]} : vector<16x128xf32> to vector<2x128xf32>
    %477 = vector.extract_strided_slice %475 {offsets = [0, 0], sizes = [2, 32], strides = [1, 1]} : vector<2x128xf32> to vector<2x32xf32>
    %478 = arith.negf %477 : vector<2x32xf32>
    %479 = math.exp %478 : vector<2x32xf32>
    %cst_92 = arith.constant 1.000000e+00 : f32
    %480 = vector.broadcast %cst_92 : f32 to vector<2x32xf32>
    %481 = arith.addf %480, %479 : vector<2x32xf32>
    %482 = arith.divf %480, %481 : vector<2x32xf32>
    %483 = vector.extract_strided_slice %475 {offsets = [0, 32], sizes = [2, 32], strides = [1, 1]} : vector<2x128xf32> to vector<2x32xf32>
    %484 = arith.negf %483 : vector<2x32xf32>
    %485 = math.exp %484 : vector<2x32xf32>
    %cst_93 = arith.constant 1.000000e+00 : f32
    %486 = vector.broadcast %cst_93 : f32 to vector<2x32xf32>
    %487 = arith.addf %486, %485 : vector<2x32xf32>
    %488 = arith.divf %486, %487 : vector<2x32xf32>
    %489 = vector.extract_strided_slice %475 {offsets = [0, 64], sizes = [2, 32], strides = [1, 1]} : vector<2x128xf32> to vector<2x32xf32>
    %490 = math.tanh %489 : vector<2x32xf32>
    %491 = vector.extract_strided_slice %475 {offsets = [0, 96], sizes = [2, 32], strides = [1, 1]} : vector<2x128xf32> to vector<2x32xf32>
    %492 = arith.negf %491 : vector<2x32xf32>
    %493 = math.exp %492 : vector<2x32xf32>
    %cst_94 = arith.constant 1.000000e+00 : f32
    %494 = vector.broadcast %cst_94 : f32 to vector<2x32xf32>
    %495 = arith.addf %494, %493 : vector<2x32xf32>
    %496 = arith.divf %494, %495 : vector<2x32xf32>
    %497 = arith.mulf %488, %473 : vector<2x32xf32>
    %498 = arith.mulf %482, %490 : vector<2x32xf32>
    %499 = arith.addf %497, %498 : vector<2x32xf32>
    %500 = math.tanh %499 : vector<2x32xf32>
    %501 = arith.mulf %496, %500 : vector<2x32xf32>
    %502 = vector.extract_strided_slice %476 {offsets = [0, 0], sizes = [2, 32], strides = [1, 1]} : vector<2x128xf32> to vector<2x32xf32>
    %503 = arith.negf %502 : vector<2x32xf32>
    %504 = math.exp %503 : vector<2x32xf32>
    %cst_95 = arith.constant 1.000000e+00 : f32
    %505 = vector.broadcast %cst_95 : f32 to vector<2x32xf32>
    %506 = arith.addf %505, %504 : vector<2x32xf32>
    %507 = arith.divf %505, %506 : vector<2x32xf32>
    %508 = vector.extract_strided_slice %476 {offsets = [0, 32], sizes = [2, 32], strides = [1, 1]} : vector<2x128xf32> to vector<2x32xf32>
    %509 = arith.negf %508 : vector<2x32xf32>
    %510 = math.exp %509 : vector<2x32xf32>
    %cst_96 = arith.constant 1.000000e+00 : f32
    %511 = vector.broadcast %cst_96 : f32 to vector<2x32xf32>
    %512 = arith.addf %511, %510 : vector<2x32xf32>
    %513 = arith.divf %511, %512 : vector<2x32xf32>
    %514 = vector.extract_strided_slice %476 {offsets = [0, 64], sizes = [2, 32], strides = [1, 1]} : vector<2x128xf32> to vector<2x32xf32>
    %515 = math.tanh %514 : vector<2x32xf32>
    %516 = vector.extract_strided_slice %476 {offsets = [0, 96], sizes = [2, 32], strides = [1, 1]} : vector<2x128xf32> to vector<2x32xf32>
    %517 = arith.negf %516 : vector<2x32xf32>
    %518 = math.exp %517 : vector<2x32xf32>
    %cst_97 = arith.constant 1.000000e+00 : f32
    %519 = vector.broadcast %cst_97 : f32 to vector<2x32xf32>
    %520 = arith.addf %519, %518 : vector<2x32xf32>
    %521 = arith.divf %519, %520 : vector<2x32xf32>
    %522 = arith.mulf %513, %474 : vector<2x32xf32>
    %523 = arith.mulf %507, %515 : vector<2x32xf32>
    %524 = arith.addf %522, %523 : vector<2x32xf32>
    %525 = math.tanh %524 : vector<2x32xf32>
    %526 = arith.mulf %521, %525 : vector<2x32xf32>
    %cst_98 = arith.constant dense<0.000000e+00> : vector<2x128xf32>
    %527 = tpu.matmul %501, %472, %cst_98 {dimension_numbers = #tpu.dot_dimension_numbers<[1], [0], [0], [1], [0, 0, 1, 1], [], []>} : vector<2x32xf32>, vector<32x128xf32>, vector<2x128xf32> -> vector<2x128xf32>
    %528 = vector.extract_strided_slice %466 {offsets = [2, 0], sizes = [2, 128], strides = [1, 1]} : vector<16x128xf32> to vector<2x128xf32>
    %529 = arith.addf %527, %528 : vector<2x128xf32>
    %530 = vector.extract_strided_slice %529 {offsets = [0, 0], sizes = [2, 32], strides = [1, 1]} : vector<2x128xf32> to vector<2x32xf32>
    %531 = arith.negf %530 : vector<2x32xf32>
    %532 = math.exp %531 : vector<2x32xf32>
    %cst_99 = arith.constant 1.000000e+00 : f32
    %533 = vector.broadcast %cst_99 : f32 to vector<2x32xf32>
    %534 = arith.addf %533, %532 : vector<2x32xf32>
    %535 = arith.divf %533, %534 : vector<2x32xf32>
    %536 = vector.extract_strided_slice %529 {offsets = [0, 32], sizes = [2, 32], strides = [1, 1]} : vector<2x128xf32> to vector<2x32xf32>
    %537 = arith.negf %536 : vector<2x32xf32>
    %538 = math.exp %537 : vector<2x32xf32>
    %cst_100 = arith.constant 1.000000e+00 : f32
    %539 = vector.broadcast %cst_100 : f32 to vector<2x32xf32>
    %540 = arith.addf %539, %538 : vector<2x32xf32>
    %541 = arith.divf %539, %540 : vector<2x32xf32>
    %542 = vector.extract_strided_slice %529 {offsets = [0, 64], sizes = [2, 32], strides = [1, 1]} : vector<2x128xf32> to vector<2x32xf32>
    %543 = math.tanh %542 : vector<2x32xf32>
    %544 = vector.extract_strided_slice %529 {offsets = [0, 96], sizes = [2, 32], strides = [1, 1]} : vector<2x128xf32> to vector<2x32xf32>
    %545 = arith.negf %544 : vector<2x32xf32>
    %546 = math.exp %545 : vector<2x32xf32>
    %cst_101 = arith.constant 1.000000e+00 : f32
    %547 = vector.broadcast %cst_101 : f32 to vector<2x32xf32>
    %548 = arith.addf %547, %546 : vector<2x32xf32>
    %549 = arith.divf %547, %548 : vector<2x32xf32>
    %550 = arith.mulf %541, %499 : vector<2x32xf32>
    %551 = arith.mulf %535, %543 : vector<2x32xf32>
    %552 = arith.addf %550, %551 : vector<2x32xf32>
    %553 = math.tanh %552 : vector<2x32xf32>
    %554 = arith.mulf %549, %553 : vector<2x32xf32>
    %cst_102 = arith.constant dense<0.000000e+00> : vector<2x128xf32>
    %555 = tpu.matmul %554, %472, %cst_102 {dimension_numbers = #tpu.dot_dimension_numbers<[1], [0], [0], [1], [0, 0, 1, 1], [], []>} : vector<2x32xf32>, vector<32x128xf32>, vector<2x128xf32> -> vector<2x128xf32>
    %556 = vector.extract_strided_slice %466 {offsets = [4, 0], sizes = [2, 128], strides = [1, 1]} : vector<16x128xf32> to vector<2x128xf32>
    %557 = arith.addf %555, %556 : vector<2x128xf32>
    %558 = vector.extract_strided_slice %557 {offsets = [0, 0], sizes = [2, 32], strides = [1, 1]} : vector<2x128xf32> to vector<2x32xf32>
    %559 = arith.negf %558 : vector<2x32xf32>
    %560 = math.exp %559 : vector<2x32xf32>
    %cst_103 = arith.constant 1.000000e+00 : f32
    %561 = vector.broadcast %cst_103 : f32 to vector<2x32xf32>
    %562 = arith.addf %561, %560 : vector<2x32xf32>
    %563 = arith.divf %561, %562 : vector<2x32xf32>
    %564 = vector.extract_strided_slice %557 {offsets = [0, 32], sizes = [2, 32], strides = [1, 1]} : vector<2x128xf32> to vector<2x32xf32>
    %565 = arith.negf %564 : vector<2x32xf32>
    %566 = math.exp %565 : vector<2x32xf32>
    %cst_104 = arith.constant 1.000000e+00 : f32
    %567 = vector.broadcast %cst_104 : f32 to vector<2x32xf32>
    %568 = arith.addf %567, %566 : vector<2x32xf32>
    %569 = arith.divf %567, %568 : vector<2x32xf32>
    %570 = vector.extract_strided_slice %557 {offsets = [0, 64], sizes = [2, 32], strides = [1, 1]} : vector<2x128xf32> to vector<2x32xf32>
    %571 = math.tanh %570 : vector<2x32xf32>
    %572 = vector.extract_strided_slice %557 {offsets = [0, 96], sizes = [2, 32], strides = [1, 1]} : vector<2x128xf32> to vector<2x32xf32>
    %573 = arith.negf %572 : vector<2x32xf32>
    %574 = math.exp %573 : vector<2x32xf32>
    %cst_105 = arith.constant 1.000000e+00 : f32
    %575 = vector.broadcast %cst_105 : f32 to vector<2x32xf32>
    %576 = arith.addf %575, %574 : vector<2x32xf32>
    %577 = arith.divf %575, %576 : vector<2x32xf32>
    %578 = arith.mulf %569, %552 : vector<2x32xf32>
    %579 = arith.mulf %563, %571 : vector<2x32xf32>
    %580 = arith.addf %578, %579 : vector<2x32xf32>
    %581 = math.tanh %580 : vector<2x32xf32>
    %582 = arith.mulf %577, %581 : vector<2x32xf32>
    %cst_106 = arith.constant dense<0.000000e+00> : vector<2x128xf32>
    %583 = tpu.matmul %582, %472, %cst_106 {dimension_numbers = #tpu.dot_dimension_numbers<[1], [0], [0], [1], [0, 0, 1, 1], [], []>} : vector<2x32xf32>, vector<32x128xf32>, vector<2x128xf32> -> vector<2x128xf32>
    %584 = vector.extract_strided_slice %466 {offsets = [6, 0], sizes = [2, 128], strides = [1, 1]} : vector<16x128xf32> to vector<2x128xf32>
    %585 = arith.addf %583, %584 : vector<2x128xf32>
    %586 = vector.extract_strided_slice %585 {offsets = [0, 0], sizes = [2, 32], strides = [1, 1]} : vector<2x128xf32> to vector<2x32xf32>
    %587 = arith.negf %586 : vector<2x32xf32>
    %588 = math.exp %587 : vector<2x32xf32>
    %cst_107 = arith.constant 1.000000e+00 : f32
    %589 = vector.broadcast %cst_107 : f32 to vector<2x32xf32>
    %590 = arith.addf %589, %588 : vector<2x32xf32>
    %591 = arith.divf %589, %590 : vector<2x32xf32>
    %592 = vector.extract_strided_slice %585 {offsets = [0, 32], sizes = [2, 32], strides = [1, 1]} : vector<2x128xf32> to vector<2x32xf32>
    %593 = arith.negf %592 : vector<2x32xf32>
    %594 = math.exp %593 : vector<2x32xf32>
    %cst_108 = arith.constant 1.000000e+00 : f32
    %595 = vector.broadcast %cst_108 : f32 to vector<2x32xf32>
    %596 = arith.addf %595, %594 : vector<2x32xf32>
    %597 = arith.divf %595, %596 : vector<2x32xf32>
    %598 = vector.extract_strided_slice %585 {offsets = [0, 64], sizes = [2, 32], strides = [1, 1]} : vector<2x128xf32> to vector<2x32xf32>
    %599 = math.tanh %598 : vector<2x32xf32>
    %600 = vector.extract_strided_slice %585 {offsets = [0, 96], sizes = [2, 32], strides = [1, 1]} : vector<2x128xf32> to vector<2x32xf32>
    %601 = arith.negf %600 : vector<2x32xf32>
    %602 = math.exp %601 : vector<2x32xf32>
    %cst_109 = arith.constant 1.000000e+00 : f32
    %603 = vector.broadcast %cst_109 : f32 to vector<2x32xf32>
    %604 = arith.addf %603, %602 : vector<2x32xf32>
    %605 = arith.divf %603, %604 : vector<2x32xf32>
    %606 = arith.mulf %597, %580 : vector<2x32xf32>
    %607 = arith.mulf %591, %599 : vector<2x32xf32>
    %608 = arith.addf %606, %607 : vector<2x32xf32>
    %609 = math.tanh %608 : vector<2x32xf32>
    %610 = arith.mulf %605, %609 : vector<2x32xf32>
    %cst_110 = arith.constant dense<0.000000e+00> : vector<2x128xf32>
    %611 = tpu.matmul %610, %472, %cst_110 {dimension_numbers = #tpu.dot_dimension_numbers<[1], [0], [0], [1], [0, 0, 1, 1], [], []>} : vector<2x32xf32>, vector<32x128xf32>, vector<2x128xf32> -> vector<2x128xf32>
    %612 = vector.extract_strided_slice %466 {offsets = [8, 0], sizes = [2, 128], strides = [1, 1]} : vector<16x128xf32> to vector<2x128xf32>
    %613 = arith.addf %611, %612 : vector<2x128xf32>
    %614 = vector.extract_strided_slice %613 {offsets = [0, 0], sizes = [2, 32], strides = [1, 1]} : vector<2x128xf32> to vector<2x32xf32>
    %615 = arith.negf %614 : vector<2x32xf32>
    %616 = math.exp %615 : vector<2x32xf32>
    %cst_111 = arith.constant 1.000000e+00 : f32
    %617 = vector.broadcast %cst_111 : f32 to vector<2x32xf32>
    %618 = arith.addf %617, %616 : vector<2x32xf32>
    %619 = arith.divf %617, %618 : vector<2x32xf32>
    %620 = vector.extract_strided_slice %613 {offsets = [0, 32], sizes = [2, 32], strides = [1, 1]} : vector<2x128xf32> to vector<2x32xf32>
    %621 = arith.negf %620 : vector<2x32xf32>
    %622 = math.exp %621 : vector<2x32xf32>
    %cst_112 = arith.constant 1.000000e+00 : f32
    %623 = vector.broadcast %cst_112 : f32 to vector<2x32xf32>
    %624 = arith.addf %623, %622 : vector<2x32xf32>
    %625 = arith.divf %623, %624 : vector<2x32xf32>
    %626 = vector.extract_strided_slice %613 {offsets = [0, 64], sizes = [2, 32], strides = [1, 1]} : vector<2x128xf32> to vector<2x32xf32>
    %627 = math.tanh %626 : vector<2x32xf32>
    %628 = vector.extract_strided_slice %613 {offsets = [0, 96], sizes = [2, 32], strides = [1, 1]} : vector<2x128xf32> to vector<2x32xf32>
    %629 = arith.negf %628 : vector<2x32xf32>
    %630 = math.exp %629 : vector<2x32xf32>
    %cst_113 = arith.constant 1.000000e+00 : f32
    %631 = vector.broadcast %cst_113 : f32 to vector<2x32xf32>
    %632 = arith.addf %631, %630 : vector<2x32xf32>
    %633 = arith.divf %631, %632 : vector<2x32xf32>
    %634 = arith.mulf %625, %608 : vector<2x32xf32>
    %635 = arith.mulf %619, %627 : vector<2x32xf32>
    %636 = arith.addf %634, %635 : vector<2x32xf32>
    %637 = math.tanh %636 : vector<2x32xf32>
    %638 = arith.mulf %633, %637 : vector<2x32xf32>
    %cst_114 = arith.constant dense<0.000000e+00> : vector<2x128xf32>
    %639 = tpu.matmul %638, %472, %cst_114 {dimension_numbers = #tpu.dot_dimension_numbers<[1], [0], [0], [1], [0, 0, 1, 1], [], []>} : vector<2x32xf32>, vector<32x128xf32>, vector<2x128xf32> -> vector<2x128xf32>
    %640 = vector.extract_strided_slice %466 {offsets = [10, 0], sizes = [2, 128], strides = [1, 1]} : vector<16x128xf32> to vector<2x128xf32>
    %641 = arith.addf %639, %640 : vector<2x128xf32>
    %642 = vector.extract_strided_slice %641 {offsets = [0, 0], sizes = [2, 32], strides = [1, 1]} : vector<2x128xf32> to vector<2x32xf32>
    %643 = arith.negf %642 : vector<2x32xf32>
    %644 = math.exp %643 : vector<2x32xf32>
    %cst_115 = arith.constant 1.000000e+00 : f32
    %645 = vector.broadcast %cst_115 : f32 to vector<2x32xf32>
    %646 = arith.addf %645, %644 : vector<2x32xf32>
    %647 = arith.divf %645, %646 : vector<2x32xf32>
    %648 = vector.extract_strided_slice %641 {offsets = [0, 32], sizes = [2, 32], strides = [1, 1]} : vector<2x128xf32> to vector<2x32xf32>
    %649 = arith.negf %648 : vector<2x32xf32>
    %650 = math.exp %649 : vector<2x32xf32>
    %cst_116 = arith.constant 1.000000e+00 : f32
    %651 = vector.broadcast %cst_116 : f32 to vector<2x32xf32>
    %652 = arith.addf %651, %650 : vector<2x32xf32>
    %653 = arith.divf %651, %652 : vector<2x32xf32>
    %654 = vector.extract_strided_slice %641 {offsets = [0, 64], sizes = [2, 32], strides = [1, 1]} : vector<2x128xf32> to vector<2x32xf32>
    %655 = math.tanh %654 : vector<2x32xf32>
    %656 = vector.extract_strided_slice %641 {offsets = [0, 96], sizes = [2, 32], strides = [1, 1]} : vector<2x128xf32> to vector<2x32xf32>
    %657 = arith.negf %656 : vector<2x32xf32>
    %658 = math.exp %657 : vector<2x32xf32>
    %cst_117 = arith.constant 1.000000e+00 : f32
    %659 = vector.broadcast %cst_117 : f32 to vector<2x32xf32>
    %660 = arith.addf %659, %658 : vector<2x32xf32>
    %661 = arith.divf %659, %660 : vector<2x32xf32>
    %662 = arith.mulf %653, %636 : vector<2x32xf32>
    %663 = arith.mulf %647, %655 : vector<2x32xf32>
    %664 = arith.addf %662, %663 : vector<2x32xf32>
    %665 = math.tanh %664 : vector<2x32xf32>
    %666 = arith.mulf %661, %665 : vector<2x32xf32>
    %cst_118 = arith.constant dense<0.000000e+00> : vector<2x128xf32>
    %667 = tpu.matmul %666, %472, %cst_118 {dimension_numbers = #tpu.dot_dimension_numbers<[1], [0], [0], [1], [0, 0, 1, 1], [], []>} : vector<2x32xf32>, vector<32x128xf32>, vector<2x128xf32> -> vector<2x128xf32>
    %668 = vector.extract_strided_slice %466 {offsets = [12, 0], sizes = [2, 128], strides = [1, 1]} : vector<16x128xf32> to vector<2x128xf32>
    %669 = arith.addf %667, %668 : vector<2x128xf32>
    %670 = vector.extract_strided_slice %669 {offsets = [0, 0], sizes = [2, 32], strides = [1, 1]} : vector<2x128xf32> to vector<2x32xf32>
    %671 = arith.negf %670 : vector<2x32xf32>
    %672 = math.exp %671 : vector<2x32xf32>
    %cst_119 = arith.constant 1.000000e+00 : f32
    %673 = vector.broadcast %cst_119 : f32 to vector<2x32xf32>
    %674 = arith.addf %673, %672 : vector<2x32xf32>
    %675 = arith.divf %673, %674 : vector<2x32xf32>
    %676 = vector.extract_strided_slice %669 {offsets = [0, 32], sizes = [2, 32], strides = [1, 1]} : vector<2x128xf32> to vector<2x32xf32>
    %677 = arith.negf %676 : vector<2x32xf32>
    %678 = math.exp %677 : vector<2x32xf32>
    %cst_120 = arith.constant 1.000000e+00 : f32
    %679 = vector.broadcast %cst_120 : f32 to vector<2x32xf32>
    %680 = arith.addf %679, %678 : vector<2x32xf32>
    %681 = arith.divf %679, %680 : vector<2x32xf32>
    %682 = vector.extract_strided_slice %669 {offsets = [0, 64], sizes = [2, 32], strides = [1, 1]} : vector<2x128xf32> to vector<2x32xf32>
    %683 = math.tanh %682 : vector<2x32xf32>
    %684 = vector.extract_strided_slice %669 {offsets = [0, 96], sizes = [2, 32], strides = [1, 1]} : vector<2x128xf32> to vector<2x32xf32>
    %685 = arith.negf %684 : vector<2x32xf32>
    %686 = math.exp %685 : vector<2x32xf32>
    %cst_121 = arith.constant 1.000000e+00 : f32
    %687 = vector.broadcast %cst_121 : f32 to vector<2x32xf32>
    %688 = arith.addf %687, %686 : vector<2x32xf32>
    %689 = arith.divf %687, %688 : vector<2x32xf32>
    %690 = arith.mulf %681, %664 : vector<2x32xf32>
    %691 = arith.mulf %675, %683 : vector<2x32xf32>
    %692 = arith.addf %690, %691 : vector<2x32xf32>
    %693 = math.tanh %692 : vector<2x32xf32>
    %694 = arith.mulf %689, %693 : vector<2x32xf32>
    %cst_122 = arith.constant dense<0.000000e+00> : vector<2x128xf32>
    %695 = tpu.matmul %694, %472, %cst_122 {dimension_numbers = #tpu.dot_dimension_numbers<[1], [0], [0], [1], [0, 0, 1, 1], [], []>} : vector<2x32xf32>, vector<32x128xf32>, vector<2x128xf32> -> vector<2x128xf32>
    %696 = vector.extract_strided_slice %466 {offsets = [14, 0], sizes = [2, 128], strides = [1, 1]} : vector<16x128xf32> to vector<2x128xf32>
    %697 = arith.addf %695, %696 : vector<2x128xf32>
    %698 = vector.extract_strided_slice %697 {offsets = [0, 0], sizes = [2, 32], strides = [1, 1]} : vector<2x128xf32> to vector<2x32xf32>
    %699 = arith.negf %698 : vector<2x32xf32>
    %700 = math.exp %699 : vector<2x32xf32>
    %cst_123 = arith.constant 1.000000e+00 : f32
    %701 = vector.broadcast %cst_123 : f32 to vector<2x32xf32>
    %702 = arith.addf %701, %700 : vector<2x32xf32>
    %703 = arith.divf %701, %702 : vector<2x32xf32>
    %704 = vector.extract_strided_slice %697 {offsets = [0, 32], sizes = [2, 32], strides = [1, 1]} : vector<2x128xf32> to vector<2x32xf32>
    %705 = arith.negf %704 : vector<2x32xf32>
    %706 = math.exp %705 : vector<2x32xf32>
    %cst_124 = arith.constant 1.000000e+00 : f32
    %707 = vector.broadcast %cst_124 : f32 to vector<2x32xf32>
    %708 = arith.addf %707, %706 : vector<2x32xf32>
    %709 = arith.divf %707, %708 : vector<2x32xf32>
    %710 = vector.extract_strided_slice %697 {offsets = [0, 64], sizes = [2, 32], strides = [1, 1]} : vector<2x128xf32> to vector<2x32xf32>
    %711 = math.tanh %710 : vector<2x32xf32>
    %712 = vector.extract_strided_slice %697 {offsets = [0, 96], sizes = [2, 32], strides = [1, 1]} : vector<2x128xf32> to vector<2x32xf32>
    %713 = arith.negf %712 : vector<2x32xf32>
    %714 = math.exp %713 : vector<2x32xf32>
    %cst_125 = arith.constant 1.000000e+00 : f32
    %715 = vector.broadcast %cst_125 : f32 to vector<2x32xf32>
    %716 = arith.addf %715, %714 : vector<2x32xf32>
    %717 = arith.divf %715, %716 : vector<2x32xf32>
    %718 = arith.mulf %709, %692 : vector<2x32xf32>
    %719 = arith.mulf %703, %711 : vector<2x32xf32>
    %720 = arith.addf %718, %719 : vector<2x32xf32>
    %721 = math.tanh %720 : vector<2x32xf32>
    %722 = arith.mulf %717, %721 : vector<2x32xf32>
    %723 = tpu.concatenate %722, %526 in 1 : vector<2x32xf32>, vector<2x32xf32> -> vector<2x64xf32>
    %c0_126 = arith.constant 0 : index
    %c0_127 = arith.constant 0 : index
    %724 = vector.load %arg13[%c0_126, %c0_127] : memref<64x4xf32, #tpu.memory_space<vmem>>, vector<64x4xf32>
    %cst_128 = arith.constant dense<0.000000e+00> : vector<2x4xf32>
    %725 = tpu.matmul %723, %724, %cst_128 {dimension_numbers = #tpu.dot_dimension_numbers<[1], [0], [0], [1], [0, 0, 1, 1], [], []>} : vector<2x64xf32>, vector<64x4xf32>, vector<2x4xf32> -> vector<2x4xf32>
    %c0_129 = arith.constant 0 : index
    %c0_130 = arith.constant 0 : index
    %726 = vector.load %arg14[%c0_129, %c0_130] : memref<1x4xf32, #tpu.memory_space<vmem>>, vector<1x4xf32>
    %727 = vector.broadcast %726 : vector<1x4xf32> to vector<2x4xf32>
    %728 = arith.addf %725, %727 : vector<2x4xf32>
    %c0_131 = arith.constant 0 : index
    %c0_132 = arith.constant 0 : index
    %729 = vector.load %arg15[%c0_131, %c0_132] : memref<2x4xf32, #tpu.memory_space<vmem>>, vector<2x4xf32>
    tpu.vector_store %arg15[%c0_131, %c0_132], %728 {strides = array<i32>} : memref<2x4xf32, #tpu.memory_space<vmem>>, vector<2x4xf32>,
    return
  }
}

</mosaic_0001>

<bundles_post_ra>
// kernel: regime_bilstm_forward.1
= control target key start
LH: loop header
LB: loop body
LE: loop exit
PB: predicated region body
PF: predicated region fallthrough
CT: control target
= control target key end

     0   :  { %20 = vsyncpa [#allocation3], 0  ;;  %s4735_s0 = inlined_call_operand.vmem [shape: f32[16,16], index: 0, kind: input, shape index: {}]   ;;  %s4736_s1 = inlined_call_operand.hbm [shape: f32[16,128], index: 1, kind: input, shape index: {}]   ;;  %s4737_s2 = inlined_call_operand.hbm [shape: f32[16,128], index: 2, kind: input, shape index: {}]   ;;  %s4738_s3 = inlined_call_operand.hbm [shape: f32[32,128], index: 3, kind: input, shape index: {}]   ;;  %s4739_s4 = inlined_call_operand.hbm [shape: f32[32,128], index: 4, kind: input, shape index: {}]   ;;  %s4740_s5 = inlined_call_operand.vmem [shape: f32[1,128], index: 5, kind: input, shape index: {}]   ;;  %s4741_s6 = inlined_call_operand.vmem [shape: f32[1,128], index: 6, kind: input, shape index: {}]   ;;  %s4742_s7 = inlined_call_operand.vmem [shape: f32[64,128], index: 7, kind: input, shape index: {}]   ;;  %s4743_s8 = inlined_call_operand.vmem [shape: f32[64,128], index: 8, kind: input, shape index: {}]   ;;  %s4744_s9 = inlined_call_operand.hbm [shape: f32[32,128], index: 9, kind: input, shape index: {}]   ;;  %s4745_s10 = inlined_call_operand.hbm [shape: f32[32,128], index: 10, kind: input, shape index: {}]   ;;  %s4746_s11 = inlined_call_operand.vmem [shape: f32[1,128], index: 11, kind: input, shape index: {}]   ;;  %s4747_s12 = inlined_call_operand.vmem [shape: f32[1,128], index: 12, kind: input, shape index: {}]   ;;  %s4748_s13 = inlined_call_operand.vmem [shape: f32[64,4], index: 13, kind: input, shape index: {}]   ;;  %s4749_s14 = inlined_call_operand.hbm [shape: f32[1,4], index: 14, kind: input, shape index: {}]   ;;  %s4750_s15 = inlined_call_operand.hbm [shape: f32[2,4], index: 15, kind: output, shape index: {}]  }
   0x1   :  { %21 = vsyncpa [#allocation6], 0 }
   0x2   :  { %22 = vsyncpa [#allocation9], 0 }
   0x3   :  { %23 = vsyncpa [#allocation12], 0 }
   0x4   :  { %24 = vsyncpa [#allocation4], 0  ;;  %s3996_s18 = smov [#allocation5]   ;;  %s3997_s20 = smov [#allocation8]  }
   0x5   :  { %s44_s19 = sshll.u32 %s3996_s18, 4  ;;  %s68_s21 = sshll.u32 %s3997_s20, 4  ;;  %s45_s19 = int_to_ptr.vmem [resolvable:$true] %s44_s19  ;;  %s4091_s21 = int_to_ptr.vmem [resolvable:$true] %s68_s21 }
   0x6   :  { %s3810_s24 = scalar_lea.hbm %s4737_s2, 256 }
   0x7   :  { %p3811_p0 = scmp.ne.s32.totalorder %s4737_s2, %s3810_s24  ;;  %p3814_p1 = scmp.lt.u32.totalorder %s3810_s24, %s4737_s2 }
   0x9   :  { %p3816_p2 = pnand %p3814_p1, %p3811_p0 }
   0xb   :  { %3819 = shalt.err (!%p3816_p2)
}
   0xc   :  { %s3820_s29 = scalar_lea.vmem %s45_s19, 256  ;;  %p3825_p4 = scmp.lt.s32.totalorder %s45_s19, %s45_s19 }
   0xd   :  { %p3821_p3 = scmp.ne.s32.totalorder %s45_s19, %s3820_s29  ;;  %p3826_p5 = scmp.lt.s32.totalorder %s3820_s29, %s3820_s29 }
   0xf   :  { %p3827_p6 = por %p3826_p5, %p3825_p4 }
  0x11   :  { %p3828_p7 = pnand %p3827_p6, %p3821_p3 }
  0x13   :  { %3831 = shalt.err (!%p3828_p7)
}
  0x14   :  { %s3998_s30 = smov 128   ;;  %s3999_s16 = smov 8  }
  0x15   :  { %50 = dma.hbm_to_vmem [thread:$0]  %s4737_s2, 256, %s45_s19, [#allocation6], %s3998_s30, %s3998_s30, %s3999_s16  }
  0x16   :  { %s3832_s23 = scalar_lea.hbm %s4739_s4, 512 }
  0x17   :  { %p3833_p8 = scmp.ne.s32.totalorder %s4739_s4, %s3832_s23  ;;  %p3836_p9 = scmp.lt.u32.totalorder %s3832_s23, %s4739_s4 }
  0x19   :  { %p3838_p10 = pnand %p3836_p9, %p3833_p8 }
  0x1b   :  { %3841 = shalt.err (!%p3838_p10)
}
  0x1c   :  { %s3842_s28 = scalar_lea.vmem %s4091_s21, 512  ;;  %p3847_p12 = scmp.lt.s32.totalorder %s4091_s21, %s4091_s21 }
  0x1d   :  { %p3843_p11 = scmp.ne.s32.totalorder %s4091_s21, %s3842_s28  ;;  %p3848_p13 = scmp.lt.s32.totalorder %s3842_s28, %s3842_s28 }
  0x1f   :  { %p3849_p0 = por %p3848_p13, %p3847_p12 }
  0x21   :  { %p3850_p1 = pnand %p3849_p0, %p3843_p11 }
  0x23   :  { %3853 = shalt.err (!%p3850_p1)
}
  0x24   :  { %74 = dma.hbm_to_vmem [thread:$0]  %s4739_s4, 512, %s4091_s21, [#allocation9], %s3998_s30, %s3998_s30, %s3999_s16  }
  0x25   :  { %s4000_s29 = smov [#allocation11]   ;;  %s4001_s18 = smov [#allocation2]  }
  0x26   :  { %s100_s17 = sshll.u32 %s4000_s29, 4  ;;  %s32_s20 = sshll.u32 %s4001_s18, 4  ;;  %s101_s17 = int_to_ptr.vmem [resolvable:$true] %s100_s17  ;;  %s4128_s20 = int_to_ptr.vmem [resolvable:$true] %s32_s20 }
  0x27   :  { %s3854_s24 = scalar_lea.hbm %s4745_s10, 512 }
  0x28   :  { %p3855_p2 = scmp.ne.s32.totalorder %s4745_s10, %s3854_s24  ;;  %p3858_p3 = scmp.lt.u32.totalorder %s3854_s24, %s4745_s10 }
  0x2a   :  { %p3860_p4 = pnand %p3858_p3, %p3855_p2 }
  0x2c   :  { %3863 = shalt.err (!%p3860_p4)
}
  0x2d   :  { %s3864_s4 = scalar_lea.vmem %s101_s17, 512  ;;  %p3869_p6 = scmp.lt.s32.totalorder %s101_s17, %s101_s17 }
  0x2e   :  { %p3865_p5 = scmp.ne.s32.totalorder %s101_s17, %s3864_s4  ;;  %p3870_p7 = scmp.lt.s32.totalorder %s3864_s4, %s3864_s4 }
  0x30   :  { %p3871_p8 = por %p3870_p7, %p3869_p6 }
  0x32   :  { %p3872_p9 = pnand %p3871_p8, %p3865_p5 }
  0x34   :  { %3875 = shalt.err (!%p3872_p9)
}
  0x35   :  { %106 = dma.hbm_to_vmem [thread:$0]  %s4745_s10, 512, %s101_s17, [#allocation12], %s3998_s30, %s3998_s30, %s3999_s16  }
  0x36   :  { %s3876_s18 = scalar_lea.hbm %s4736_s1, 256 }
  0x37   :  { %p3877_p10 = scmp.ne.s32.totalorder %s4736_s1, %s3876_s18  ;;  %p3880_p11 = scmp.lt.u32.totalorder %s3876_s18, %s4736_s1 }
  0x39   :  { %p3882_p12 = pnand %p3880_p11, %p3877_p10 }
  0x3b   :  { %3885 = shalt.err (!%p3882_p12)
}
  0x3c   :  { %s3886_s26 = scalar_lea.vmem %s4128_s20, 256  ;;  %p3891_p0 = scmp.lt.s32.totalorder %s4128_s20, %s4128_s20 }
  0x3d   :  { %p3887_p13 = scmp.ne.s32.totalorder %s4128_s20, %s3886_s26  ;;  %p3892_p1 = scmp.lt.s32.totalorder %s3886_s26, %s3886_s26 }
  0x3f   :  { %p3893_p2 = por %p3892_p1, %p3891_p0 }
  0x41   :  { %p3894_p3 = pnand %p3893_p2, %p3887_p13 }
  0x43   :  { %3897 = shalt.err (!%p3894_p3)
}
  0x44   :  { %38 = dma.hbm_to_vmem [thread:$0]  %s4736_s1, 256, %s4128_s20, [#allocation3], %s3998_s30, %s3998_s30, %s3999_s16  }
  0x45   :  { %s4002_s27 = smov [#allocation7]   ;;  %s4003_s4 = smov [#allocation10]  }
  0x46   :  { %s56_s28 = sshll.u32 %s4002_s27, 4  ;;  %s88_s21 = sshll.u32 %s4003_s4, 4  ;;  %s57_s28 = int_to_ptr.vmem [resolvable:$true] %s56_s28  ;;  %s4165_s21 = int_to_ptr.vmem [resolvable:$true] %s88_s21 }
  0x47   :  { %s3898_s29 = scalar_lea.hbm %s4738_s3, 512 }
  0x48   :  { %p3899_p4 = scmp.ne.s32.totalorder %s4738_s3, %s3898_s29  ;;  %p3902_p5 = scmp.lt.u32.totalorder %s3898_s29, %s4738_s3 }
  0x4a   :  { %p3904_p6 = pnand %p3902_p5, %p3899_p4 }
  0x4c   :  { %3907 = shalt.err (!%p3904_p6)
}
  0x4d   :  { %s3908_s1 = scalar_lea.vmem %s57_s28, 512  ;;  %p3913_p8 = scmp.lt.s32.totalorder %s57_s28, %s57_s28 }
  0x4e   :  { %p3909_p7 = scmp.ne.s32.totalorder %s57_s28, %s3908_s1  ;;  %p3914_p9 = scmp.lt.s32.totalorder %s3908_s1, %s3908_s1 }
  0x50   :  { %p3915_p10 = por %p3914_p9, %p3913_p8 }
  0x52   :  { %p3916_p11 = pnand %p3915_p10, %p3909_p7 }
  0x54   :  { %3919 = shalt.err (!%p3916_p11)
}
  0x55   :  { %62 = dma.hbm_to_vmem [thread:$0]  %s4738_s3, 512, %s57_s28, [#allocation6], %s3998_s30, %s3998_s30, %s3999_s16  }
  0x56   :  { %s3920_s17 = scalar_lea.hbm %s4744_s9, 512 }
  0x57   :  { %p3921_p12 = scmp.ne.s32.totalorder %s4744_s9, %s3920_s17  ;;  %p3924_p13 = scmp.lt.u32.totalorder %s3920_s17, %s4744_s9 }
  0x59   :  { %p3926_p0 = pnand %p3924_p13, %p3921_p12 }
  0x5b   :  { %3929 = shalt.err (!%p3926_p0)
}
  0x5c   :  { %s3930_s29 = scalar_lea.vmem %s4165_s21, 512  ;;  %p3935_p2 = scmp.lt.s32.totalorder %s4165_s21, %s4165_s21 }
  0x5d   :  { %p3931_p1 = scmp.ne.s32.totalorder %s4165_s21, %s3930_s29  ;;  %p3936_p3 = scmp.lt.s32.totalorder %s3930_s29, %s3930_s29 }
  0x5f   :  { %p3937_p4 = por %p3936_p3, %p3935_p2 }
  0x61   :  { %p3938_p5 = pnand %p3937_p4, %p3931_p1 }
  0x63   :  { %3941 = shalt.err (!%p3938_p5)
}
  0x64   :  { %94 = dma.hbm_to_vmem [thread:$0]  %s4744_s9, 512, %s4165_s21, [#allocation9], %s3998_s30, %s3998_s30, %s3999_s16  }
  0x65   :  { %s4004_s18 = smov [#allocation13]   ;;  %s3942_s1 = scalar_lea.hbm %s4749_s14, 16 }
  0x66   :  { %s119_s22 = sshll.u32 %s4004_s18, 4  ;;  %p3943_p6 = scmp.ne.s32.totalorder %s4749_s14, %s3942_s1  ;;  %s120_s22 = int_to_ptr.vmem [resolvable:$true] %s119_s22 }
  0x67   :  { %p3946_p7 = scmp.lt.u32.totalorder %s3942_s1, %s4749_s14 }
  0x69   :  { %p3948_p8 = pnand %p3946_p7, %p3943_p6 }
  0x6b   :  { %3951 = shalt.err (!%p3948_p8)
}
  0x6c   :  { %s3952_s17 = scalar_lea.vmem %s120_s22, 16  ;;  %s3956_s9 = scalar_lea.vmem %s120_s22, 32 }
  0x6d   :  { %p3953_p9 = scmp.ne.s32.totalorder %s120_s22, %s3952_s17  ;;  %p3957_p10 = scmp.lt.s32.totalorder %s120_s22, %s120_s22 }
  0x6e   :  { %p3958_p11 = scmp.lt.s32.totalorder %s3956_s9, %s3952_s17 }
  0x70   :  { %p3959_p12 = por %p3958_p11, %p3957_p10 }
  0x72   :  { %p3960_p13 = pnand %p3959_p12, %p3953_p9 }
  0x74   :  { %3963 = shalt.err (!%p3960_p13)
}
  0x75   :  { %122 = dma.hbm_to_vmem [thread:$0]  %s4749_s14, 16, %s120_s22, [#allocation12]  }
  0x76   :  { %3986 = dma.done.wait [#allocation3], 256  }
  0x77   :  { %3987 = vsyncadd [#allocation3], 4294967040 }
  0x78   :  { %3988 = dma.done.wait [#allocation6], 768  }
  0x79   :  { %3989 = vsyncadd [#allocation6], 4294966528 }
  0x7a   :  { %3990 = dma.done.wait [#allocation9], 1024  }
  0x7b   :  { %3991 = vsyncadd [#allocation9], 4294966272 }
  0x7c   :  { %3992 = dma.done.wait [#allocation12], 528  }
  0x7d   :  { %3993 = vsyncadd [#allocation12], 4294966768  ;;  %vm155_vm0 = vcmask 130048   ;;  %v146_v0 = vld [vmem:[#allocation2] sm:$0xff]  ;;  %v147_v1 = vld [vmem:[#allocation2 + $0x8] sm:$0xff]  ;;  %v4007_v41 = vmov 0.0|0.0  }
  0x7e   :  { %v144_v2 = vld [vmem:[%s4735_s0] sm:$0xff]  ;;  %v3417_v3 = vpack.c.bf16 %v147_v1, %v146_v0  ;;  %v237_v4 = vld [vmem:[#allocation5] sm:$0xff]  ;;  %v238_v5 = vld [vmem:[#allocation5 + $0x8] sm:$0xff]  ;;  %3431 = vmatprep.subr.bf16.mxu1 %v4007_v41  ;;  %vm4008_vm1 = vmmov 0   ;;  %v4009_v49 = vmov 0.0   ;;  %vm383_vm2 = vcmask 261120  }
  0x7f   :  { %3119 = vmatprep.mubr.msk.f32.mxu0 %vm155_vm0, %v144_v2  ;;  %v3421_v6 = vpack.c.bf16 %v238_v5, %v237_v4  ;;  %v145_v7 = vld [vmem:[%s4735_s0 + $0x8] sm:$0xff]  ;;  %v2913_v8 = vld [vmem:[%s4740_s5] ss:$0 sm:$0xff]  ;;  %s4005_s0 = smov 64   ;;  %s4006_s5 = smov 32   ;;  %v327_v44 = vld [vmem:[#allocation8 + $0x10] sm:$0xff]  ;;  %3148 = vmatprep.mubr.msk.f32.mxu1 %vm4008_vm1, %v4009_v49 }
  0x80   :  { %3418 = vmatprep.subr.bf16.mxu0 %v3417_v3  ;;  %v2916_v12 = vld [vmem:[%s4741_s6] ss:$0 sm:$0xff]  ;;  %v326_v39 = vld [vmem:[#allocation8 + $0x8] sm:$0xff]  ;;  %v328_v45 = vld [vmem:[#allocation8 + $0x18] sm:$0xff]  ;;  %vm1807_vm3 = vcmask 1041408   ;;  %vm1809_vm4 = vcmask 1043456  }
  0x81   :  { %3420 = vmatpush3.bf16.msra.mxu0 %v3417_v3  ;;  %v325_v38 = vld [vmem:[#allocation8] sm:$0xff]  ;;  %v322_v43 = vld [vmem:[#allocation7 + $0x8] sm:$0xff]  ;;  %v323_v47 = vld [vmem:[#allocation7 + $0x10] sm:$0xff]  ;;  %v4263_v50 = vpack.c.bf16 %v328_v45, %v327_v44  ;;  %vm1811_vm5 = vcmask 1045504   ;;  %vm1865_vm6 = vcmask 523264   ;;  %vm2893_vm7 = vcmask 25600  }
  0x82   :  { %3422 = vmatprep.subr.bf16.mxu0 %v3421_v6  ;;  %v321_v40 = vld [vmem:[#allocation7] sm:$0xff]  ;;  %v4253_v42 = vpack.c.bf16 %v326_v39, %v325_v38  ;;  %v324_v48 = vld [vmem:[#allocation7 + $0x18] sm:$0xff] }
  0x83   :  { %v4256_v46 = vpack.c.bf16 %v322_v43, %v321_v40  ;;  %v4267_v51 = vpack.c.bf16 %v324_v48, %v323_v47 }
  0x84   :  { %3120 = vmatmul.mubr.msk.f32.vlgmr.msra.gmra.mrb[0].mxu0 %vm155_vm0, %v145_v7  ;;  %3433 = vmatpush3.bf16.msra.mxu1 %v4253_v42 }
  0x85   :  { %3424 = vmatpush3.bf16.msra.mxu0 %v3421_v6  ;;  %3126 = vmatprep.mubr.msk.f32.mxu0 %vm155_vm0, %v144_v2 }
  0x86   :  { %3425 = vmatprep.subr.bf16.mxu0 %v4007_v41  ;;  %3434 = vmatprep.subr.bf16.mxu1 %v4007_v41 }
  0x88   :  { %3127 = vmatmul.mubr.msk.f32.vlgmr.msra.gmra.mrb[2].mxu0 %vm155_vm0, %v145_v7  ;;  %3436 = vmatpush3.bf16.msra.mxu1 %v4263_v50 }
  0x89   :  { %3137 = vmatprep.mubr.msk.f32.mxu0 %vm4008_vm1, %v4009_v49  ;;  %3427 = vmatpush3.bf16.msra.mxu0 %v4256_v46 }
  0x8a   :  { %3428 = vmatprep.subr.bf16.mxu0 %v4007_v41  ;;  %3443 = vmatprep.subr.bf16.mxu1 %v4007_v41 }
  0x8d   :  { %3430 = vmatpush3.bf16.msra.mxu0 %v4267_v51 }
  0x8e   :  { %3437 = vmatprep.subr.bf16.mxu0 %v4007_v41 }
 0x157   :  { %v3121_v9 = vpop.f32.mrb[0].mxu0 }
 0x158   :  { %v4227_v10 = vadd.f32 %v3121_v9, %v2913_v8  ;;  %v228_v11 = vpop.f32.mrb[1].mxu0 }
 0x159   :  { %v4236_v17 = vadd.f32 %v2913_v8, %v228_v11 }
 0x15b   :  { %v3128_v13 = vpop.f32.mrb[2].mxu0  ;;  %v2919_v21 = vmul.f32 -1.442695, %v4236_v17  ;;  %v381_v1 = vrot.slane %v4236_v17, 2  ;;  %v589_v44 = vrot.slane %v4236_v17, 4 }
 0x15c   :  { %v4232_v14 = vadd.f32 %v3128_v13, %v2916_v12  ;;  %v312_v15 = vpop.f32.mrb[3].mxu0 }
 0x15d   :  { %v4234_v16 = vadd.f32 %v2916_v12, %v312_v15 }
 0x15e   :  { %3610 = vtanh.f32 %v4232_v14  ;;  %v2920_v20 = vmul.f32 -1.442695, %v4232_v14  ;;  %v461_v61 = vrot.slane %v4232_v14, 4  ;;  %v666_v38 = vrot.slane %v4232_v14, 2 }
 0x15f   :  { %3612 = vtanh.f32 %v4236_v17 }
 0x160   :  { %3614 = vpow2.f32 %v2920_v20 }
 0x161   :  { %3616 = vpow2.f32 %v2919_v21 }
 0x168   :  { %v3611_v18 = vpop.eup %3610 }
 0x169   :  { %362 = vrot.lane.b32.xlu0 %v3611_v18, %s4005_s0  ;;  %v3613_v19 = vpop.eup %3612 }
 0x16a   :  { %v3615_v22 = vpop.eup %3614 }
 0x16b   :  { %v356_v23 = vadd.f32 1.0, %v3615_v22  ;;  %v3617_v24 = vpop.eup %3616 }
 0x16c   :  { %v332_v25 = vadd.f32 1.0, %v3617_v24 }
 0x16d   :  { %338 = vrot.lane.b32.xlu0 %v3613_v19, %s4005_s0  ;;  %3618 = vrcp.f32 %v356_v23 }
 0x16e   :  { %3620 = vrcp.f32 %v332_v25 }
 0x177   :  { %v3619_v26 = vpop.eup %3618 }
 0x178   :  { %v3621_v29 = vpop.eup %3620  ;;  %v360_v32 = vmul.f32 0.0, %v3619_v26 }
 0x179   :  { %v336_v35 = vmul.f32 0.0, %v3621_v29 }
 0x1db   :  { %v363_v27 = vpop.permute.xlu0 %362 }
 0x1dc   :  { %v365_v28 = vmul.f32 %v3619_v26, %v363_v27 }
 0x1de   :  { %367 = vrot.lane.b32.xlu1 %v365_v28, %s4006_s5 }
 0x1df   :  { %v339_v30 = vpop.permute.xlu0 %338 }
 0x1e0   :  { %v341_v31 = vmul.f32 %v3621_v29, %v339_v30 }
 0x1e2   :  { %343 = vrot.lane.b32.xlu1 %v341_v31, %s4006_s5 }
 0x250   :  { %v368_v33 = vpop.permute.xlu1 %367 }
 0x251   :  { %v4246_v34 = vadd.f32 %v368_v33, %v360_v32 }
 0x253   :  { %3622 = vtanh.f32 %v4246_v34  ;;  %v567_v23 = vrot.slane %v4246_v34, 6 }
 0x254   :  { %v344_v36 = vpop.permute.xlu1 %343 }
 0x255   :  { %v4249_v37 = vadd.f32 %v344_v36, %v336_v35 }
 0x257   :  { %3624 = vtanh.f32 %v4249_v37 }
 0x25d   :  { %v3623_v52 = vpop.eup %3622 }
 0x25e   :  { %373 = vrot.lane.b32.xlu0 %v3623_v52, %s4005_s0 }
 0x261   :  { %v3625_v53 = vpop.eup %3624 }
 0x262   :  { %349 = vrot.lane.b32.xlu1 %v3625_v53, %s4005_s0 }
 0x2d0   :  { %v374_v54 = vpop.permute.xlu0 %373 }
 0x2d1   :  { %v4276_v55 = vmul.f32 %v3619_v26, %v374_v54 }
 0x2d3   :  { %v457_v56 = vrot.slane %v4276_v55, 6 }
 0x2d4   :  { %v350_v57 = vpop.permute.xlu1 %349 }
 0x2d5   :  { %v4279_v58 = vmul.f32 %v3621_v29, %v350_v57  ;;  %458 = vrot.lane.b32.xlu0 %v457_v56, %s4006_s5 }
 0x2d7   :  { %378 = vrot.lane.b32.xlu1 %v4279_v58, %s4006_s5 }
 0x347   :  { %v459_v59 = vpop.permute.xlu0 %458 }
 0x348   :  { %3149 = vmatmul.mubr.msk.f32.vlgmr.msra.gmra.mrb[0].mxu1 %vm383_vm2, %v459_v59 }
 0x349   :  { %v379_v60 = vpop.permute.xlu1 %378  ;;  %3445 = vmatpush3.bf16.msra.mxu1 %v4253_v42  ;;  %3170 = vmatprep.mubr.msk.f32.mxu1 %vm4008_vm1, %v4009_v49 }
 0x34a   :  { %3138 = vmatmul.mubr.msk.f32.vlgmr.msra.gmra.mrb[4].mxu0 %vm383_vm2, %v379_v60  ;;  %3446 = vmatprep.subr.bf16.mxu1 %v4007_v41 }
 0x34b   :  { %3439 = vmatpush3.bf16.msra.mxu0 %v4256_v46  ;;  %3159 = vmatprep.mubr.msk.f32.mxu0 %vm4008_vm1, %v4009_v49 }
 0x34c   :  { %3440 = vmatprep.subr.bf16.mxu0 %v4007_v41 }
 0x34d   :  { %3448 = vmatpush3.bf16.msra.mxu1 %v4263_v50 }
 0x34e   :  { %3455 = vmatprep.subr.bf16.mxu1 %v4007_v41 }
 0x34f   :  { %3442 = vmatpush3.bf16.msra.mxu0 %v4267_v51 }
 0x350   :  { %3449 = vmatprep.subr.bf16.mxu0 %v4007_v41 }
 0x41b   :  { %v531_v62 = vpop.f32.mrb[0].mxu1 }
 0x41c   :  { %v532_v63 = vadd.f32 %v531_v62, %v461_v61  ;;  %v3150_v0 = vpop.f32.mrb[1].mxu1 }
 0x41d   :  { %v452_v2 = vpop.f32.mrb[4].mxu0 }
 0x41e   :  { %3626 = vtanh.f32 %v532_v63  ;;  %v453_v3 = vadd.f32 %v452_v2, %v381_v1  ;;  %v3139_v4 = vpop.f32.mrb[5].mxu0  ;;  %v2924_v7 = vmul.f32 -1.442695, %v532_v63 }
 0x420   :  { %3628 = vtanh.f32 %v453_v3  ;;  %v2923_v8 = vmul.f32 -1.442695, %v453_v3 }
 0x421   :  { %3630 = vpow2.f32 %v2924_v7 }
 0x422   :  { %3632 = vpow2.f32 %v2923_v8 }
 0x428   :  { %v3627_v5 = vpop.eup %3626 }
 0x429   :  { %571 = vrot.lane.b32.xlu0 %v3627_v5, %s4005_s0 }
 0x42a   :  { %v3629_v6 = vpop.eup %3628 }
 0x42b   :  { %544 = vrot.lane.b32.xlu1 %v3629_v6, %s4005_s0  ;;  %v3631_v9 = vpop.eup %3630 }
 0x42c   :  { %v3633_v11 = vpop.eup %3632  ;;  %v562_v12 = vadd.f32 1.0, %v3631_v9 }
 0x42d   :  { %v538_v13 = vadd.f32 1.0, %v3633_v11 }
 0x42e   :  { %3634 = vrcp.f32 %v562_v12 }
 0x42f   :  { %3636 = vrcp.f32 %v538_v13 }
 0x438   :  { %v3635_v15 = vpop.eup %3634 }
 0x439   :  { %v3637_v20 = vpop.eup %3636  ;;  %v569_v24 = vmul.f32 %v3635_v15, %v567_v23 }
 0x43a   :  { %v542_v27 = vmul.f32 %v3637_v20, %v4249_v37 }
 0x49b   :  { %v572_v18 = vpop.permute.xlu0 %571 }
 0x49c   :  { %v574_v19 = vmul.f32 %v3635_v15, %v572_v18 }
 0x49d   :  { %v545_v21 = vpop.permute.xlu1 %544 }
 0x49e   :  { %576 = vrot.lane.b32.xlu0 %v574_v19, %s4006_s5  ;;  %v547_v22 = vmul.f32 %v3637_v20, %v545_v21 }
 0x4a0   :  { %549 = vrot.lane.b32.xlu1 %v547_v22, %s4006_s5 }
 0x510   :  { %v577_v25 = vpop.permute.xlu0 %576 }
 0x511   :  { %v579_v26 = vadd.f32 %v577_v25, %v569_v24 }
 0x512   :  { %v550_v28 = vpop.permute.xlu1 %549 }
 0x513   :  { %3638 = vtanh.f32 %v579_v26  ;;  %v552_v29 = vadd.f32 %v550_v28, %v542_v27  ;;  %v791_v28 = vrot.slane %v4236_v17, 6 }
 0x515   :  { %3640 = vtanh.f32 %v552_v29 }
 0x51d   :  { %v3639_v30 = vpop.eup %3638 }
 0x51e   :  { %582 = vrot.lane.b32.xlu0 %v3639_v30, %s4005_s0 }
 0x51f   :  { %v3641_v31 = vpop.eup %3640 }
 0x520   :  { %555 = vrot.lane.b32.xlu1 %v3641_v31, %s4005_s0 }
 0x590   :  { %v583_v32 = vpop.permute.xlu0 %582 }
 0x591   :  { %v4308_v33 = vmul.f32 %v3635_v15, %v583_v32 }
 0x592   :  { %v556_v35 = vpop.permute.xlu1 %555 }
 0x593   :  { %664 = vrot.lane.b32.xlu0 %v4308_v33, %s4006_s5  ;;  %v4312_v34 = vmul.f32 %v3637_v20, %v556_v35 }
 0x595   :  { %587 = vrot.lane.b32.xlu1 %v4312_v34, %s4006_s5  ;;  %v1794_v18 = vrot.slane %v4312_v34, 6 }
 0x597   :  { %v1808_v22 = vsel %vm1807_vm3, %v4279_v58, %v1794_v18 }
 0x605   :  { %v665_v36 = vpop.permute.xlu0 %664 }
 0x606   :  { %3171 = vmatmul.mubr.msk.f32.vlgmr.msra.gmra.mrb[2].mxu1 %vm383_vm2, %v665_v36 }
 0x607   :  { %3457 = vmatpush3.bf16.msra.mxu1 %v4253_v42  ;;  %3192 = vmatprep.mubr.msk.f32.mxu1 %vm4008_vm1, %v4009_v49  ;;  %v588_v37 = vpop.permute.xlu1 %587 }
 0x608   :  { %3458 = vmatprep.subr.bf16.mxu1 %v4007_v41  ;;  %3160 = vmatmul.mubr.msk.f32.vlgmr.msra.gmra.mrb[6].mxu0 %vm383_vm2, %v588_v37 }
 0x609   :  { %3451 = vmatpush3.bf16.msra.mxu0 %v4256_v46  ;;  %3181 = vmatprep.mubr.msk.f32.mxu0 %vm4008_vm1, %v4009_v49 }
 0x60a   :  { %3452 = vmatprep.subr.bf16.mxu0 %v4007_v41 }
 0x60b   :  { %3460 = vmatpush3.bf16.msra.mxu1 %v4263_v50 }
 0x60c   :  { %3467 = vmatprep.subr.bf16.mxu1 %v4007_v41 }
 0x60d   :  { %3454 = vmatpush3.bf16.msra.mxu0 %v4267_v51 }
 0x60e   :  { %3461 = vmatprep.subr.bf16.mxu0 %v4007_v41 }
 0x6d9   :  { %v736_v39 = vpop.f32.mrb[2].mxu1 }
 0x6da   :  { %v737_v40 = vadd.f32 %v736_v39, %v666_v38  ;;  %v3172_v43 = vpop.f32.mrb[3].mxu1 }
 0x6db   :  { %v659_v45 = vpop.f32.mrb[6].mxu0 }
 0x6dc   :  { %3642 = vtanh.f32 %v737_v40  ;;  %v660_v47 = vadd.f32 %v659_v45, %v589_v44  ;;  %v3161_v48 = vpop.f32.mrb[7].mxu0  ;;  %v2928_v54 = vmul.f32 -1.442695, %v737_v40 }
 0x6de   :  { %3644 = vtanh.f32 %v660_v47  ;;  %v2927_v56 = vmul.f32 -1.442695, %v660_v47 }
 0x6df   :  { %3646 = vpow2.f32 %v2928_v54 }
 0x6e0   :  { %3648 = vpow2.f32 %v2927_v56 }
 0x6e6   :  { %v3643_v52 = vpop.eup %3642 }
 0x6e7   :  { %773 = vrot.lane.b32.xlu0 %v3643_v52, %s4005_s0 }
 0x6e8   :  { %v3645_v53 = vpop.eup %3644 }
 0x6e9   :  { %749 = vrot.lane.b32.xlu1 %v3645_v53, %s4005_s0  ;;  %v3647_v57 = vpop.eup %3646 }
 0x6ea   :  { %v3649_v59 = vpop.eup %3648  ;;  %v767_v60 = vadd.f32 1.0, %v3647_v57 }
 0x6eb   :  { %v743_v61 = vadd.f32 1.0, %v3649_v59 }
 0x6ec   :  { %3650 = vrcp.f32 %v767_v60 }
 0x6ed   :  { %3652 = vrcp.f32 %v743_v61 }
 0x6f6   :  { %v3651_v62 = vpop.eup %3650 }
 0x6f7   :  { %v3653_v1 = vpop.eup %3652  ;;  %v771_v4 = vmul.f32 %v3651_v62, %v579_v26 }
 0x6f8   :  { %v747_v7 = vmul.f32 %v3653_v1, %v552_v29 }
 0x759   :  { %v774_v63 = vpop.permute.xlu0 %773 }
 0x75a   :  { %v776_v0 = vmul.f32 %v3651_v62, %v774_v63 }
 0x75b   :  { %v750_v2 = vpop.permute.xlu1 %749 }
 0x75c   :  { %778 = vrot.lane.b32.xlu0 %v776_v0, %s4006_s5  ;;  %v752_v3 = vmul.f32 %v3653_v1, %v750_v2  ;;  %v1824_v0 = vrot.slane %v4308_v33, 4 }
 0x75e   :  { %754 = vrot.lane.b32.xlu1 %v752_v3, %s4006_s5 }
 0x7ce   :  { %v779_v5 = vpop.permute.xlu0 %778 }
 0x7cf   :  { %v4336_v6 = vadd.f32 %v779_v5, %v771_v4 }
 0x7d0   :  { %v755_v8 = vpop.permute.xlu1 %754 }
 0x7d1   :  { %3654 = vtanh.f32 %v4336_v6  ;;  %v4339_v9 = vadd.f32 %v755_v8, %v747_v7  ;;  %v1067_v8 = vrot.slane %v4234_v16, 6 }
 0x7d3   :  { %3656 = vtanh.f32 %v4339_v9 }
 0x7db   :  { %v3655_v11 = vpop.eup %3654 }
 0x7dc   :  { %784 = vrot.lane.b32.xlu0 %v3655_v11, %s4005_s0 }
 0x7dd   :  { %v3657_v12 = vpop.eup %3656 }
 0x7de   :  { %760 = vrot.lane.b32.xlu1 %v3657_v12, %s4005_s0 }
 0x84e   :  { %v785_v13 = vpop.permute.xlu0 %784 }
 0x84f   :  { %v4344_v15 = vmul.f32 %v3651_v62, %v785_v13 }
 0x850   :  { %v761_v19 = vpop.permute.xlu1 %760 }
 0x851   :  { %866 = vrot.lane.b32.xlu0 %v4344_v15, %s4006_s5  ;;  %v763_v20 = vmul.f32 %v3653_v1, %v761_v19  ;;  %v1822_v62 = vrot.slane %v4344_v15, 6 }
 0x853   :  { %v1796_v21 = vrot.slane %v763_v20, 4  ;;  %789 = vrot.lane.b32.xlu1 %v763_v20, %s4006_s5 }
 0x855   :  { %v4353_v23 = vsel %vm1809_vm4, %v1808_v22, %v1796_v21 }
 0x8c3   :  { %v867_v24 = vpop.permute.xlu0 %866 }
 0x8c4   :  { %3193 = vmatmul.mubr.msk.f32.vlgmr.msra.gmra.mrb[4].mxu1 %vm383_vm2, %v867_v24 }
 0x8c5   :  { %3469 = vmatpush3.bf16.msra.mxu1 %v4253_v42  ;;  %3214 = vmatprep.mubr.msk.f32.mxu1 %vm4008_vm1, %v4009_v49  ;;  %v790_v25 = vpop.permute.xlu1 %789 }
 0x8c6   :  { %3470 = vmatprep.subr.bf16.mxu1 %v4007_v41  ;;  %3182 = vmatmul.mubr.msk.f32.vlgmr.msra.gmra.mrb[8].mxu0 %vm383_vm2, %v790_v25 }
 0x8c7   :  { %3463 = vmatpush3.bf16.msra.mxu0 %v4256_v46  ;;  %3203 = vmatprep.mubr.msk.f32.mxu0 %vm4008_vm1, %v4009_v49 }
 0x8c8   :  { %3464 = vmatprep.subr.bf16.mxu0 %v4007_v41 }
 0x8c9   :  { %3472 = vmatpush3.bf16.msra.mxu1 %v4263_v50 }
 0x8ca   :  { %3479 = vmatprep.subr.bf16.mxu1 %v4007_v41 }
 0x8cb   :  { %3466 = vmatpush3.bf16.msra.mxu0 %v4267_v51 }
 0x8cc   :  { %3473 = vmatprep.subr.bf16.mxu0 %v4007_v41 }
 0x997   :  { %v936_v58 = vpop.f32.mrb[4].mxu1 }
 0x998   :  { %v937_v26 = vadd.f32 %v936_v58, %v4232_v14  ;;  %v3194_v27 = vpop.f32.mrb[5].mxu1 }
 0x999   :  { %v861_v29 = vpop.f32.mrb[8].mxu0 }
 0x99a   :  { %3658 = vtanh.f32 %v937_v26  ;;  %v862_v30 = vadd.f32 %v861_v29, %v791_v28  ;;  %v3183_v31 = vpop.f32.mrb[9].mxu0  ;;  %v2932_v34 = vmul.f32 -1.442695, %v937_v26 }
 0x99c   :  { %3660 = vtanh.f32 %v862_v30  ;;  %v2931_v36 = vmul.f32 -1.442695, %v862_v30 }
 0x99d   :  { %3662 = vpow2.f32 %v2932_v34 }
 0x99e   :  { %3664 = vpow2.f32 %v2931_v36 }
 0x9a4   :  { %v3659_v32 = vpop.eup %3658 }
 0x9a5   :  { %973 = vrot.lane.b32.xlu0 %v3659_v32, %s4005_s0 }
 0x9a6   :  { %v3661_v35 = vpop.eup %3660 }
 0x9a7   :  { %949 = vrot.lane.b32.xlu1 %v3661_v35, %s4005_s0  ;;  %v3663_v37 = vpop.eup %3662 }
 0x9a8   :  { %v3665_v14 = vpop.eup %3664  ;;  %v967_v38 = vadd.f32 1.0, %v3663_v37 }
 0x9a9   :  { %v943_v39 = vadd.f32 1.0, %v3665_v14 }
 0x9aa   :  { %3666 = vrcp.f32 %v967_v38 }
 0x9ab   :  { %3668 = vrcp.f32 %v943_v39 }
 0x9b4   :  { %v3667_v17 = vpop.eup %3666 }
 0x9b5   :  { %v3669_v44 = vpop.eup %3668  ;;  %v971_v48 = vmul.f32 %v3667_v17, %v4336_v6 }
 0x9b6   :  { %v947_v54 = vmul.f32 %v3669_v44, %v4339_v9 }
 0xa17   :  { %v974_v40 = vpop.permute.xlu0 %973 }
 0xa18   :  { %v976_v43 = vmul.f32 %v3667_v17, %v974_v40 }
 0xa19   :  { %v950_v45 = vpop.permute.xlu1 %949 }
 0xa1a   :  { %978 = vrot.lane.b32.xlu0 %v976_v43, %s4006_s5  ;;  %v952_v47 = vmul.f32 %v3669_v44, %v950_v45 }
 0xa1c   :  { %954 = vrot.lane.b32.xlu1 %v952_v47, %s4006_s5 }
 0xa8c   :  { %v979_v52 = vpop.permute.xlu0 %978 }
 0xa8d   :  { %v4376_v53 = vadd.f32 %v979_v52, %v971_v48  ;;  %v1270_v48 = vrot.slane %v4234_v16, 4 }
 0xa8e   :  { %v955_v56 = vpop.permute.xlu1 %954 }
 0xa8f   :  { %3670 = vtanh.f32 %v4376_v53  ;;  %v4380_v57 = vadd.f32 %v955_v56, %v947_v54  ;;  %v1193_v56 = vrot.slane %v4227_v10, 2 }
 0xa91   :  { %3672 = vtanh.f32 %v4380_v57 }
 0xa99   :  { %v3671_v59 = vpop.eup %3670 }
 0xa9a   :  { %984 = vrot.lane.b32.xlu0 %v3671_v59, %s4005_s0 }
 0xa9b   :  { %v3673_v60 = vpop.eup %3672 }
 0xa9c   :  { %960 = vrot.lane.b32.xlu1 %v3673_v60, %s4005_s0 }
 0xb0c   :  { %v985_v61 = vpop.permute.xlu0 %984 }
 0xb0d   :  { %v987_v63 = vmul.f32 %v3667_v17, %v985_v61 }
 0xb0e   :  { %v961_v2 = vpop.permute.xlu1 %960 }
 0xb0f   :  { %v1829_v1 = vsel %vm1807_vm3, %v987_v63, %v1822_v62  ;;  %1064 = vrot.lane.b32.xlu0 %v987_v63, %s4006_s5  ;;  %v963_v3 = vmul.f32 %v3669_v44, %v961_v2 }
 0xb10   :  { %v4390_v4 = vsel %vm1809_vm4, %v1829_v1, %v1824_v0 }
 0xb11   :  { %v1798_v5 = vrot.slane %v963_v3, 2  ;;  %989 = vrot.lane.b32.xlu1 %v963_v3, %s4006_s5 }
 0xb13   :  { %v4395_v6 = vsel %vm1811_vm5, %v4353_v23, %v1798_v5 }
 0xb81   :  { %v1065_v7 = vpop.permute.xlu0 %1064 }
 0xb82   :  { %3215 = vmatmul.mubr.msk.f32.vlgmr.msra.gmra.mrb[6].mxu1 %vm383_vm2, %v1065_v7 }
 0xb83   :  { %3481 = vmatpush3.bf16.msra.mxu1 %v4253_v42  ;;  %3236 = vmatprep.mubr.msk.f32.mxu1 %vm4008_vm1, %v4009_v49  ;;  %v990_v33 = vpop.permute.xlu1 %989 }
 0xb84   :  { %3482 = vmatprep.subr.bf16.mxu1 %v4007_v41  ;;  %3204 = vmatmul.mubr.msk.f32.vlgmr.msra.gmra.mrb[10].mxu0 %vm383_vm2, %v990_v33 }
 0xb85   :  { %3475 = vmatpush3.bf16.msra.mxu0 %v4256_v46  ;;  %3225 = vmatprep.mubr.msk.f32.mxu0 %vm4008_vm1, %v4009_v49 }
 0xb86   :  { %3476 = vmatprep.subr.bf16.mxu0 %v4007_v41 }
 0xb87   :  { %3484 = vmatpush3.bf16.msra.mxu1 %v4263_v50 }
 0xb88   :  { %3491 = vmatprep.subr.bf16.mxu1 %v4007_v41 }
 0xb89   :  { %3478 = vmatpush3.bf16.msra.mxu0 %v4267_v51 }
 0xb8a   :  { %3485 = vmatprep.subr.bf16.mxu0 %v4007_v41 }
 0xc55   :  { %v1137_v9 = vpop.f32.mrb[6].mxu1 }
 0xc56   :  { %v1138_v11 = vadd.f32 %v1137_v9, %v1067_v8  ;;  %v3216_v12 = vpop.f32.mrb[7].mxu1 }
 0xc57   :  { %v1059_v13 = vpop.f32.mrb[10].mxu0 }
 0xc58   :  { %3674 = vtanh.f32 %v1138_v11  ;;  %v1060_v15 = vadd.f32 %v1059_v13, %v4227_v10  ;;  %v3205_v18 = vpop.f32.mrb[11].mxu0  ;;  %v2936_v21 = vmul.f32 -1.442695, %v1138_v11 }
 0xc5a   :  { %3676 = vtanh.f32 %v1060_v15  ;;  %v2935_v22 = vmul.f32 -1.442695, %v1060_v15 }
 0xc5b   :  { %3678 = vpow2.f32 %v2936_v21 }
 0xc5c   :  { %3680 = vpow2.f32 %v2935_v22 }
 0xc62   :  { %v3675_v19 = vpop.eup %3674 }
 0xc63   :  { %1174 = vrot.lane.b32.xlu0 %v3675_v19, %s4005_s0 }
 0xc64   :  { %v3677_v20 = vpop.eup %3676 }
 0xc65   :  { %1150 = vrot.lane.b32.xlu1 %v3677_v20, %s4005_s0  ;;  %v3679_v23 = vpop.eup %3678 }
 0xc66   :  { %v3681_v24 = vpop.eup %3680  ;;  %v1168_v25 = vadd.f32 1.0, %v3679_v23 }
 0xc67   :  { %v1144_v58 = vadd.f32 1.0, %v3681_v24 }
 0xc68   :  { %3682 = vrcp.f32 %v1168_v25 }
 0xc69   :  { %3684 = vrcp.f32 %v1144_v58 }
 0xc72   :  { %v3683_v26 = vpop.eup %3682 }
 0xc73   :  { %v3685_v29 = vpop.eup %3684  ;;  %v1172_v32 = vmul.f32 %v3683_v26, %v4376_v53 }
 0xc74   :  { %v1148_v36 = vmul.f32 %v3685_v29, %v4380_v57 }
 0xcd5   :  { %v1175_v27 = vpop.permute.xlu0 %1174 }
 0xcd6   :  { %v1177_v28 = vmul.f32 %v3683_v26, %v1175_v27 }
 0xcd7   :  { %v1151_v30 = vpop.permute.xlu1 %1150 }
 0xcd8   :  { %1179 = vrot.lane.b32.xlu0 %v1177_v28, %s4006_s5  ;;  %v1153_v31 = vmul.f32 %v3685_v29, %v1151_v30 }
 0xcda   :  { %1155 = vrot.lane.b32.xlu1 %v1153_v31, %s4006_s5 }
 0xd4a   :  { %v1180_v35 = vpop.permute.xlu0 %1179 }
 0xd4b   :  { %v1182_v34 = vadd.f32 %v1180_v35, %v1172_v32  ;;  %v1395_v32 = vrot.slane %v4227_v10, 4 }
 0xd4c   :  { %v1156_v37 = vpop.permute.xlu1 %1155 }
 0xd4d   :  { %3686 = vtanh.f32 %v1182_v34  ;;  %v1158_v14 = vadd.f32 %v1156_v37, %v1148_v36 }
 0xd4f   :  { %3688 = vtanh.f32 %v1158_v14 }
 0xd57   :  { %v3687_v38 = vpop.eup %3686 }
 0xd58   :  { %1185 = vrot.lane.b32.xlu0 %v3687_v38, %s4005_s0 }
 0xd59   :  { %v3689_v39 = vpop.eup %3688 }
 0xd5a   :  { %1161 = vrot.lane.b32.xlu1 %v3689_v39, %s4005_s0 }
 0xdca   :  { %v1186_v17 = vpop.permute.xlu0 %1185 }
 0xdcb   :  { %v4421_v40 = vmul.f32 %v3683_v26, %v1186_v17 }
 0xdcc   :  { %v1162_v43 = vpop.permute.xlu1 %1161 }
 0xdcd   :  { %1268 = vrot.lane.b32.xlu0 %v4421_v40, %s4006_s5  ;;  %v4425_v44 = vmul.f32 %v3685_v29, %v1162_v43 }
 0xdcf   :  { %1190 = vrot.lane.b32.xlu1 %v4425_v44, %s4006_s5 }
 0xe3f   :  { %v1269_v45 = vpop.permute.xlu0 %1268 }
 0xe40   :  { %3237 = vmatmul.mubr.msk.f32.vlgmr.msra.gmra.mrb[8].mxu1 %vm383_vm2, %v1269_v45 }
 0xe41   :  { %3493 = vmatpush3.bf16.msra.mxu1 %v4253_v42  ;;  %3258 = vmatprep.mubr.msk.f32.mxu1 %vm4008_vm1, %v4009_v49  ;;  %v1191_v47 = vpop.permute.xlu1 %1190 }
 0xe42   :  { %3494 = vmatprep.subr.bf16.mxu1 %v4007_v41  ;;  %3226 = vmatmul.mubr.msk.f32.vlgmr.msra.gmra.mrb[12].mxu0 %vm383_vm2, %v1191_v47 }
 0xe43   :  { %3487 = vmatpush3.bf16.msra.mxu0 %v4256_v46  ;;  %3247 = vmatprep.mubr.msk.f32.mxu0 %vm4008_vm1, %v4009_v49 }
 0xe44   :  { %3488 = vmatprep.subr.bf16.mxu0 %v4007_v41 }
 0xe45   :  { %3496 = vmatpush3.bf16.msra.mxu1 %v4263_v50 }
 0xe46   :  { %3503 = vmatprep.subr.bf16.mxu1 %v4007_v41 }
 0xe47   :  { %3490 = vmatpush3.bf16.msra.mxu0 %v4267_v51 }
 0xe48   :  { %3497 = vmatprep.subr.bf16.mxu0 %v4007_v41 }
 0xf13   :  { %v1340_v52 = vpop.f32.mrb[8].mxu1 }
 0xf14   :  { %v1341_v53 = vadd.f32 %v1340_v52, %v1270_v48  ;;  %v3238_v54 = vpop.f32.mrb[9].mxu1 }
 0xf15   :  { %v1263_v57 = vpop.f32.mrb[12].mxu0 }
 0xf16   :  { %3690 = vtanh.f32 %v1341_v53  ;;  %v1264_v59 = vadd.f32 %v1263_v57, %v1193_v56  ;;  %v3227_v60 = vpop.f32.mrb[13].mxu0  ;;  %v2940_v63 = vmul.f32 -1.442695, %v1341_v53 }
 0xf18   :  { %3692 = vtanh.f32 %v1264_v59  ;;  %v2939_v0 = vmul.f32 -1.442695, %v1264_v59 }
 0xf19   :  { %3694 = vpow2.f32 %v2940_v63 }
 0xf1a   :  { %3696 = vpow2.f32 %v2939_v0 }
 0xf20   :  { %v3691_v61 = vpop.eup %3690 }
 0xf21   :  { %1377 = vrot.lane.b32.xlu0 %v3691_v61, %s4005_s0 }
 0xf22   :  { %v3693_v62 = vpop.eup %3692 }
 0xf23   :  { %1353 = vrot.lane.b32.xlu1 %v3693_v62, %s4005_s0  ;;  %v3695_v1 = vpop.eup %3694 }
 0xf24   :  { %v3697_v2 = vpop.eup %3696  ;;  %v1371_v3 = vadd.f32 1.0, %v3695_v1 }
 0xf25   :  { %v1347_v5 = vadd.f32 1.0, %v3697_v2 }
 0xf26   :  { %3698 = vrcp.f32 %v1371_v3 }
 0xf27   :  { %3700 = vrcp.f32 %v1347_v5 }
 0xf30   :  { %v3699_v7 = vpop.eup %3698 }
 0xf31   :  { %v3701_v9 = vpop.eup %3700  ;;  %v1375_v13 = vmul.f32 %v3699_v7, %v1182_v34 }
 0xf32   :  { %v1351_v19 = vmul.f32 %v3701_v9, %v1158_v14 }
 0xf93   :  { %v1378_v33 = vpop.permute.xlu0 %1377 }
 0xf94   :  { %v1380_v8 = vmul.f32 %v3699_v7, %v1378_v33 }
 0xf95   :  { %v1354_v11 = vpop.permute.xlu1 %1353 }
 0xf96   :  { %1382 = vrot.lane.b32.xlu0 %v1380_v8, %s4006_s5  ;;  %v1356_v12 = vmul.f32 %v3701_v9, %v1354_v11 }
 0xf98   :  { %1358 = vrot.lane.b32.xlu1 %v1356_v12, %s4006_s5 }
0x1008   :  { %v1383_v15 = vpop.permute.xlu0 %1382 }
0x1009   :  { %v1385_v18 = vadd.f32 %v1383_v15, %v1375_v13 }
0x100a   :  { %v1359_v20 = vpop.permute.xlu1 %1358 }
0x100b   :  { %3702 = vtanh.f32 %v1385_v18  ;;  %v1361_v21 = vadd.f32 %v1359_v20, %v1351_v19 }
0x100d   :  { %3704 = vtanh.f32 %v1361_v21 }
0x1015   :  { %v3703_v22 = vpop.eup %3702 }
0x1016   :  { %1388 = vrot.lane.b32.xlu0 %v3703_v22, %s4005_s0 }
0x1017   :  { %v3705_v23 = vpop.eup %3704 }
0x1018   :  { %1364 = vrot.lane.b32.xlu1 %v3705_v23, %s4005_s0 }
0x1088   :  { %v1389_v24 = vpop.permute.xlu0 %1388 }
0x1089   :  { %v4451_v25 = vmul.f32 %v3699_v7, %v1389_v24 }
0x108a   :  { %v1365_v58 = vpop.permute.xlu1 %1364 }
0x108b   :  { %1470 = vrot.lane.b32.xlu0 %v4451_v25, %s4006_s5  ;;  %v4455_v26 = vmul.f32 %v3701_v9, %v1365_v58 }
0x108d   :  { %1393 = vrot.lane.b32.xlu1 %v4455_v26, %s4006_s5  ;;  %v1800_v2 = vrot.slane %v4455_v26, 6 }
0x108f   :  { %v1813_v33 = vsel %vm1807_vm3, %v4425_v44, %v1800_v2  ;;  %v1857_v2 = vld [vmem:[%s4742_s7 + $0x38] sm:$0xff] }
0x10fd   :  { %v1471_v27 = vpop.permute.xlu0 %1470 }
0x10fe   :  { %3259 = vmatmul.mubr.msk.f32.vlgmr.msra.gmra.mrb[10].mxu1 %vm383_vm2, %v1471_v27 }
0x10ff   :  { %3505 = vmatpush3.bf16.msra.mxu1 %v4253_v42  ;;  %3280 = vmatprep.mubr.msk.f32.mxu1 %vm4008_vm1, %v4009_v49  ;;  %v1394_v28 = vpop.permute.xlu1 %1393  ;;  %v1472_v42 = vrot.slane %v4234_v16, 2 }
0x1100   :  { %3506 = vmatprep.subr.bf16.mxu1 %v4007_v41  ;;  %3248 = vmatmul.mubr.msk.f32.vlgmr.msra.gmra.mrb[14].mxu0 %vm383_vm2, %v1394_v28 }
0x1101   :  { %3499 = vmatpush3.bf16.msra.mxu0 %v4256_v46  ;;  %3269 = vmatprep.mubr.msk.f32.mxu0 %vm4008_vm1, %v4009_v49 }
0x1102   :  { %3500 = vmatprep.subr.bf16.mxu0 %v4007_v41 }
0x1103   :  { %3508 = vmatpush3.bf16.msra.mxu1 %v4263_v50 }
0x1105   :  { %3502 = vmatpush3.bf16.msra.mxu0 %v4267_v51 }
0x11d1   :  { %v1542_v29 = vpop.f32.mrb[10].mxu1 }
0x11d2   :  { %v1543_v30 = vadd.f32 %v1542_v29, %v1472_v42  ;;  %v3260_v31 = vpop.f32.mrb[11].mxu1 }
0x11d3   :  { %v1465_v35 = vpop.f32.mrb[14].mxu0 }
0x11d4   :  { %3706 = vtanh.f32 %v1543_v30  ;;  %v1466_v34 = vadd.f32 %v1465_v35, %v1395_v32  ;;  %v3249_v46 = vpop.f32.mrb[15].mxu0  ;;  %v2944_v37 = vmul.f32 -1.442695, %v1543_v30 }
0x11d6   :  { %3708 = vtanh.f32 %v1466_v34  ;;  %v2943_v51 = vmul.f32 -1.442695, %v1466_v34 }
0x11d7   :  { %3710 = vpow2.f32 %v2944_v37  ;;  %v1850_v37 = vld [vmem:[%s4742_s7] sm:$0xff] }
0x11d8   :  { %3712 = vpow2.f32 %v2943_v51  ;;  %v1851_v51 = vld [vmem:[%s4742_s7 + $0x8] sm:$0xff] }
0x11de   :  { %v3707_v36 = vpop.eup %3706 }
0x11df   :  { %1579 = vrot.lane.b32.xlu0 %v3707_v36, %s4005_s0 }
0x11e0   :  { %v3709_v50 = vpop.eup %3708 }
0x11e1   :  { %1555 = vrot.lane.b32.xlu1 %v3709_v50, %s4005_s0  ;;  %v3711_v14 = vpop.eup %3710 }
0x11e2   :  { %v3713_v38 = vpop.eup %3712  ;;  %v1573_v39 = vadd.f32 1.0, %v3711_v14  ;;  %v1947_v14 = vld [vmem:[%s4743_s8] sm:$0xff] }
0x11e3   :  { %v1549_v17 = vadd.f32 1.0, %v3713_v38  ;;  %v3509_v38 = vpack.c.bf16 %v1851_v51, %v1850_v37  ;;  %v2036_v37 = vld [vmem:[#allocation10] sm:$0xff]  ;;  %v2037_v51 = vld [vmem:[#allocation10 + $0x8] sm:$0xff] }
0x11e4   :  { %3714 = vrcp.f32 %v1573_v39  ;;  %v1948_v39 = vld [vmem:[%s4743_s8 + $0x8] sm:$0xff] }
0x11e5   :  { %3716 = vrcp.f32 %v1549_v17  ;;  %v1852_v17 = vld [vmem:[%s4742_s7 + $0x10] sm:$0xff]  ;;  %3510 = vmatprep.subr.bf16.mxu0 %v3509_v38 }
0x11ee   :  { %v3715_v43 = vpop.eup %3714 }
0x11ef   :  { %v3717_v48 = vpop.eup %3716  ;;  %v1577_v54 = vmul.f32 %v3715_v43, %v1385_v18  ;;  %v1597_v18 = vrot.slane %v4227_v10, 6 }
0x11f0   :  { %v1553_v59 = vmul.f32 %v3717_v48, %v1361_v21 }
0x1251   :  { %v1580_v45 = vpop.permute.xlu0 %1579 }
0x1252   :  { %v1582_v47 = vmul.f32 %v3715_v43, %v1580_v45  ;;  %v3525_v45 = vpack.c.bf16 %v1948_v39, %v1947_v14  ;;  %v2038_v14 = vld [vmem:[#allocation10 + $0x10] sm:$0xff]  ;;  %v2039_v39 = vld [vmem:[#allocation10 + $0x18] sm:$0xff] }
0x1253   :  { %v1556_v52 = vpop.permute.xlu1 %1555 }
0x1254   :  { %1584 = vrot.lane.b32.xlu0 %v1582_v47, %s4006_s5  ;;  %v1558_v53 = vmul.f32 %v3717_v48, %v1556_v52  ;;  %v1950_v52 = vld [vmem:[%s4743_s8 + $0x18] sm:$0xff]  ;;  %3526 = vmatprep.subr.bf16.mxu1 %v3525_v45 }
0x1256   :  { %1560 = vrot.lane.b32.xlu1 %v1558_v53, %s4006_s5  ;;  %v1854_v53 = vld [vmem:[%s4742_s7 + $0x20] sm:$0xff] }
0x12c6   :  { %v1585_v56 = vpop.permute.xlu0 %1584 }
0x12c7   :  { %v1587_v57 = vadd.f32 %v1585_v56, %v1577_v54 }
0x12c8   :  { %v1561_v60 = vpop.permute.xlu1 %1560 }
0x12c9   :  { %3718 = vtanh.f32 %v1587_v57  ;;  %v1563_v61 = vadd.f32 %v1561_v60, %v1553_v59  ;;  %v1951_v59 = vld [vmem:[%s4743_s8 + $0x20] sm:$0xff]  ;;  %v1952_v60 = vld [vmem:[%s4743_s8 + $0x28] sm:$0xff] }
0x12cb   :  { %3720 = vtanh.f32 %v1563_v61 }
0x12d3   :  { %v3719_v62 = vpop.eup %3718 }
0x12d4   :  { %1590 = vrot.lane.b32.xlu0 %v3719_v62, %s4005_s0 }
0x12d5   :  { %v3721_v63 = vpop.eup %3720 }
0x12d6   :  { %1566 = vrot.lane.b32.xlu1 %v3721_v63, %s4005_s0  ;;  %v3533_v63 = vpack.c.bf16 %v1952_v60, %v1951_v59 }
0x1346   :  { %v1591_v0 = vpop.permute.xlu0 %1590 }
0x1347   :  { %v4479_v1 = vmul.f32 %v3715_v43, %v1591_v0  ;;  %v1853_v43 = vld [vmem:[%s4742_s7 + $0x18] sm:$0xff]  ;;  %v1856_v0 = vld [vmem:[%s4742_s7 + $0x30] sm:$0xff] }
0x1348   :  { %v1567_v3 = vpop.permute.xlu1 %1566  ;;  %v3513_v47 = vpack.c.bf16 %v1853_v43, %v1852_v17  ;;  %v4602_v17 = vpack.c.bf16 %v2039_v39, %v2038_v14 }
0x1349   :  { %1672 = vrot.lane.b32.xlu0 %v4479_v1, %s4006_s5  ;;  %v1569_v5 = vmul.f32 %v3717_v48, %v1567_v3  ;;  %v1949_v48 = vld [vmem:[%s4743_s8 + $0x10] sm:$0xff] }
0x134a   :  { %v3529_v56 = vpack.c.bf16 %v1950_v52, %v1949_v48  ;;  %v1953_v3 = vld [vmem:[%s4743_s8 + $0x30] sm:$0xff] }
0x134b   :  { %v1802_v7 = vrot.slane %v1569_v5, 4  ;;  %1595 = vrot.lane.b32.xlu1 %v1569_v5, %s4006_s5  ;;  %v3521_v5 = vpack.c.bf16 %v1857_v2, %v1856_v0 }
0x134d   :  { %v4488_v8 = vsel %vm1809_vm4, %v1813_v33, %v1802_v7 }
0x13bb   :  { %v1673_v9 = vpop.permute.xlu0 %1672 }
0x13bc   :  { %3281 = vmatmul.mubr.msk.f32.vlgmr.msra.gmra.mrb[12].mxu1 %vm383_vm2, %v1673_v9  ;;  %v1816_v9 = vrot.slane %v4479_v1, 6 }
0x13bd   :  { %v1596_v11 = vpop.permute.xlu1 %1595  ;;  %3528 = vmatpush3.bf16.msra.mxu1 %v3525_v45 }
0x13be   :  { %3270 = vmatmul.mubr.msk.f32.vlgmr.msra.gmra.mrb[16].mxu0 %vm383_vm2, %v1596_v11  ;;  %3530 = vmatprep.subr.bf16.mxu1 %v3529_v56 }
0x13bf   :  { %3512 = vmatpush3.bf16.msra.mxu0 %v3509_v38  ;;  %v4599_v38 = vpack.c.bf16 %v2037_v51, %v2036_v37 }
0x13c0   :  { %3514 = vmatprep.subr.bf16.mxu0 %v3513_v47 }
0x13c1   :  { %3532 = vmatpush3.bf16.msra.mxu1 %v3529_v56 }
0x13c2   :  { %3534 = vmatprep.subr.bf16.mxu1 %v3533_v63 }
0x13c3   :  { %3516 = vmatpush3.bf16.msra.mxu0 %v3513_v47 }
0x13c5   :  { %3536 = vmatpush3.bf16.msra.mxu1 %v3533_v63 }
0x148f   :  { %v1742_v12 = vpop.f32.mrb[12].mxu1 }
0x1490   :  { %v1743_v13 = vadd.f32 %v1742_v12, %v4234_v16  ;;  %v3282_v15 = vpop.f32.mrb[13].mxu1  ;;  %v1818_v12 = vrot.slane %v4451_v25, 4 }
0x1491   :  { %v1667_v19 = vpop.f32.mrb[16].mxu0 }
0x1492   :  { %3722 = vtanh.f32 %v1743_v13  ;;  %v1668_v20 = vadd.f32 %v1667_v19, %v1597_v18  ;;  %v3271_v21 = vpop.f32.mrb[17].mxu0  ;;  %v2948_v23 = vmul.f32 -1.442695, %v1743_v13  ;;  %v1820_v13 = vrot.slane %v4421_v40, 2 }
0x1493   :  { %v1831_v40 = vsel %vm1811_vm5, %v4390_v4, %v4276_v55  ;;  %v2949_v55 = vld [vmem:[%s4746_s11] ss:$0 sm:$0xff] }
0x1494   :  { %3724 = vtanh.f32 %v1668_v20  ;;  %v2947_v24 = vmul.f32 -1.442695, %v1668_v20 }
0x1495   :  { %3726 = vpow2.f32 %v2948_v23 }
0x1496   :  { %3728 = vpow2.f32 %v2947_v24 }
0x149c   :  { %v3723_v44 = vpop.eup %3722 }
0x149d   :  { %1779 = vrot.lane.b32.xlu0 %v3723_v44, %s4005_s0 }
0x149e   :  { %v3725_v22 = vpop.eup %3724 }
0x149f   :  { %1755 = vrot.lane.b32.xlu1 %v3725_v22, %s4005_s0  ;;  %v3727_v58 = vpop.eup %3726 }
0x14a0   :  { %v3729_v16 = vpop.eup %3728  ;;  %v1773_v26 = vadd.f32 1.0, %v3727_v58 }
0x14a1   :  { %v1749_v27 = vadd.f32 1.0, %v3729_v16 }
0x14a2   :  { %3730 = vrcp.f32 %v1773_v26 }
0x14a3   :  { %3732 = vrcp.f32 %v1749_v27 }
0x14ac   :  { %v4496_v10 = vpop.eup %3730 }
0x14ad   :  { %v4499_v29 = vpop.eup %3732  ;;  %v1777_v32 = vmul.f32 %v4496_v10, %v1587_v57  ;;  %v1855_v57 = vld [vmem:[%s4742_s7 + $0x28] sm:$0xff] }
0x14ae   :  { %v1753_v46 = vmul.f32 %v4499_v29, %v1563_v61  ;;  %v3517_v62 = vpack.c.bf16 %v1855_v57, %v1854_v53 }
0x14b0   :  { %3518 = vmatprep.subr.bf16.mxu0 %v3517_v62 }
0x14b1   :  { %3520 = vmatpush3.bf16.msra.mxu0 %v3517_v62 }
0x14b2   :  { %3522 = vmatprep.subr.bf16.mxu0 %v3521_v5 }
0x14b5   :  { %3524 = vmatpush3.bf16.msra.mxu0 %v3521_v5 }
0x14b6   :  { %3541 = vmatprep.subr.bf16.mxu0 %v4007_v41 }
0x150f   :  { %v1780_v28 = vpop.permute.xlu0 %1779 }
0x1510   :  { %v1782_v42 = vmul.f32 %v4496_v10, %v1780_v28 }
0x1511   :  { %v1756_v30 = vpop.permute.xlu1 %1755 }
0x1512   :  { %1784 = vrot.lane.b32.xlu0 %v1782_v42, %s4006_s5  ;;  %v1758_v31 = vmul.f32 %v4499_v29, %v1756_v30 }
0x1514   :  { %1760 = vrot.lane.b32.xlu1 %v1758_v31, %s4006_s5 }
0x1584   :  { %v1785_v35 = vpop.permute.xlu0 %1784 }
0x1585   :  { %v1787_v34 = vadd.f32 %v1785_v35, %v1777_v32 }
0x1586   :  { %v1761_v36 = vpop.permute.xlu1 %1760 }
0x1587   :  { %3734 = vtanh.f32 %v1787_v34  ;;  %v1763_v50 = vadd.f32 %v1761_v36, %v1753_v46 }
0x1589   :  { %3736 = vtanh.f32 %v1763_v50 }
0x1591   :  { %v3735_v54 = vpop.eup %3734 }
0x1592   :  { %1790 = vrot.lane.b32.xlu0 %v3735_v54, %s4005_s0 }
0x1593   :  { %v3737_v61 = vpop.eup %3736 }
0x1594   :  { %1766 = vrot.lane.b32.xlu1 %v3737_v61, %s4005_s0 }
0x1596   :  { %1834 = vrot.lane.b32.xlu0 %v4395_v6, %s4006_s5  ;;  %v1954_v6 = vld [vmem:[%s4743_s8 + $0x38] sm:$0xff] }
0x1597   :  { %v3537_v7 = vpack.c.bf16 %v1954_v6, %v1953_v3 }
0x1599   :  { %3538 = vmatprep.subr.bf16.mxu1 %v3537_v7 }
0x159a   :  { %3540 = vmatpush3.bf16.msra.mxu1 %v3537_v7 }
0x159b   :  { %3547 = vmatprep.subr.bf16.mxu1 %v4007_v41 }
0x1604   :  { %v1791_v33 = vpop.permute.xlu0 %1790 }
0x1605   :  { %v1793_v11 = vmul.f32 %v4496_v10, %v1791_v33 }
0x1606   :  { %v1767_v18 = vpop.permute.xlu1 %1766 }
0x1607   :  { %v1826_v15 = vsel %vm1807_vm3, %v1793_v11, %v1816_v9  ;;  %v1769_v19 = vmul.f32 %v4499_v29, %v1767_v18 }
0x1608   :  { %v1827_v20 = vsel %vm1809_vm4, %v1826_v15, %v1818_v12  ;;  %v1835_v25 = vpop.permute.xlu0 %1834 }
0x1609   :  { %v1828_v21 = vsel %vm1811_vm5, %v1827_v20, %v1820_v13  ;;  %v1805_v44 = vrot.slane %v1769_v19, 2 }
0x160a   :  { %1842 = vrot.lane.b32.xlu1 %v1828_v21, %s4005_s0 }
0x160b   :  { %v1815_v1 = vsel %vm1811_vm5, %v4488_v8, %v1805_v44 }
0x160c   :  { %1836 = vrot.lane.b32.xlu0 %v1815_v1, %s4006_s5 }
0x160e   :  { %1844 = vrot.lane.b32.xlu1 %v1831_v40, %s4005_s0 }
0x167c   :  { %v1843_v22 = vpop.permute.xlu1 %1842 }
0x167d   :  { %v1848_v23 = vsel %vm383_vm2, %v1835_v25, %v1843_v22 }
0x167e   :  { %3299 = vmatprep.mubr.msk.f32.mxu0 %vm1865_vm6, %v1848_v23  ;;  %3318 = vmatprep.mubr.msk.f32.mxu1 %vm1865_vm6, %v1848_v23  ;;  %v1837_v24 = vpop.permute.xlu0 %1836 }
0x1680   :  { %v1845_v58 = vpop.permute.xlu1 %1844 }
0x1681   :  { %v1849_v8 = vsel %vm383_vm2, %v1837_v24, %v1845_v58 }
0x1682   :  { %3300 = vmatmul.mubr.msk.f32.vlgmr.msra.gmra.mrb[18].mxu0 %vm1865_vm6, %v1849_v8  ;;  %3319 = vmatmul.mubr.msk.f32.vlgmr.msra.gmra.mrb[14].mxu1 %vm1865_vm6, %v1849_v8 }
0x1683   :  { %3329 = vmatprep.mubr.msk.f32.mxu0 %vm4008_vm1, %v4009_v49  ;;  %3340 = vmatprep.mubr.msk.f32.mxu1 %vm4008_vm1, %v4009_v49 }
0x1684   :  { %3543 = vmatpush3.bf16.msra.mxu0 %v4599_v38  ;;  %3549 = vmatpush3.bf16.msra.mxu1 %v4599_v38 }
0x1685   :  { %3544 = vmatprep.subr.bf16.mxu0 %v4007_v41  ;;  %3550 = vmatprep.subr.bf16.mxu1 %v4007_v41 }
0x1688   :  { %3546 = vmatpush3.bf16.msra.mxu0 %v4602_v17  ;;  %3552 = vmatpush3.bf16.msra.mxu1 %v4602_v17 }
0x1689   :  { %3553 = vmatprep.subr.bf16.mxu0 %v4007_v41  ;;  %3559 = vmatprep.subr.bf16.mxu1 %v4007_v41 }
0x1755   :  { %v3301_v4 = vpop.f32.mrb[18].mxu0  ;;  %v4589_v16 = vpop.f32.mrb[14].mxu1 }
0x1756   :  { %v4591_v26 = vadd.f32 %v3301_v4, %v2949_v55  ;;  %v1938_v27 = vpop.f32.mrb[19].mxu0  ;;  %v2028_v10 = vpop.f32.mrb[15].mxu1 }
0x1757   :  { %v4593_v28 = vadd.f32 %v2949_v55, %v1938_v27 }
0x1759   :  { %3738 = vtanh.f32 %v4593_v28  ;;  %v2955_v29 = vmul.f32 -1.442695, %v4593_v28  ;;  %v2092_v52 = vrot.slane %v4593_v28, 2  ;;  %v2193_v11 = vrot.slane %v4593_v28, 4 }
0x175a   :  { %v2294_v4 = vrot.slane %v4593_v28, 6 }
0x175b   :  { %3740 = vpow2.f32 %v2955_v29 }
0x1763   :  { %v3739_v42 = vpop.eup %3738 }
0x1764   :  { %2049 = vrot.lane.b32.xlu0 %v3739_v42, %s4005_s0 }
0x1765   :  { %v3741_v30 = vpop.eup %3740 }
0x1766   :  { %v2043_v31 = vadd.f32 1.0, %v3741_v30 }
0x1768   :  { %3742 = vrcp.f32 %v2043_v31 }
0x1772   :  { %v3743_v32 = vpop.eup %3742 }
0x1773   :  { %v2047_v46 = vmul.f32 0.0, %v3743_v32 }
0x17d6   :  { %v2050_v35 = vpop.permute.xlu0 %2049 }
0x17d7   :  { %v2052_v34 = vmul.f32 %v3743_v32, %v2050_v35 }
0x17d9   :  { %2054 = vrot.lane.b32.xlu1 %v2052_v34, %s4006_s5 }
0x184b   :  { %v2055_v36 = vpop.permute.xlu1 %2054 }
0x184c   :  { %v2057_v50 = vadd.f32 %v2055_v36, %v2047_v46 }
0x184e   :  { %3744 = vtanh.f32 %v2057_v50 }
0x1858   :  { %v3745_v43 = vpop.eup %3744 }
0x1859   :  { %2060 = vrot.lane.b32.xlu0 %v3745_v43, %s4005_s0 }
0x18cb   :  { %v2061_v45 = vpop.permute.xlu0 %2060 }
0x18cc   :  { %v2063_v47 = vmul.f32 %v3743_v32, %v2061_v45 }
0x18ce   :  { %2089 = vrot.lane.b32.xlu1 %v2063_v47, %s4006_s5 }
0x1940   :  { %v2090_v48 = vpop.permute.xlu1 %2089 }
0x1941   :  { %3330 = vmatmul.mubr.msk.f32.vlgmr.msra.gmra.mrb[20].mxu0 %vm383_vm2, %v2090_v48 }
0x1942   :  { %3555 = vmatpush3.bf16.msra.mxu0 %v4599_v38  ;;  %3351 = vmatprep.mubr.msk.f32.mxu0 %vm4008_vm1, %v4009_v49 }
0x1943   :  { %3556 = vmatprep.subr.bf16.mxu0 %v4007_v41 }
0x1946   :  { %3558 = vmatpush3.bf16.msra.mxu0 %v4602_v17 }
0x1947   :  { %3565 = vmatprep.subr.bf16.mxu0 %v4007_v41 }
0x1a14   :  { %v2162_v53 = vpop.f32.mrb[20].mxu0 }
0x1a15   :  { %v2163_v54 = vadd.f32 %v2162_v53, %v2092_v52  ;;  %v3331_v56 = vpop.f32.mrb[21].mxu0 }
0x1a17   :  { %3746 = vtanh.f32 %v2163_v54  ;;  %v2958_v59 = vmul.f32 -1.442695, %v2163_v54 }
0x1a19   :  { %3748 = vpow2.f32 %v2958_v59 }
0x1a21   :  { %v3747_v57 = vpop.eup %3746 }
0x1a22   :  { %2175 = vrot.lane.b32.xlu0 %v3747_v57, %s4005_s0 }
0x1a23   :  { %v3749_v60 = vpop.eup %3748 }
0x1a24   :  { %v2169_v61 = vadd.f32 1.0, %v3749_v60 }
0x1a26   :  { %3750 = vrcp.f32 %v2169_v61 }
0x1a30   :  { %v3751_v62 = vpop.eup %3750 }
0x1a31   :  { %v2173_v2 = vmul.f32 %v3751_v62, %v2057_v50 }
0x1a94   :  { %v2176_v63 = vpop.permute.xlu0 %2175 }
0x1a95   :  { %v2178_v0 = vmul.f32 %v3751_v62, %v2176_v63 }
0x1a97   :  { %2180 = vrot.lane.b32.xlu1 %v2178_v0, %s4006_s5 }
0x1b09   :  { %v2181_v3 = vpop.permute.xlu1 %2180 }
0x1b0a   :  { %v2183_v5 = vadd.f32 %v2181_v3, %v2173_v2 }
0x1b0c   :  { %3752 = vtanh.f32 %v2183_v5 }
0x1b16   :  { %v3753_v6 = vpop.eup %3752 }
0x1b17   :  { %2186 = vrot.lane.b32.xlu0 %v3753_v6, %s4005_s0 }
0x1b89   :  { %v2187_v7 = vpop.permute.xlu0 %2186 }
0x1b8a   :  { %v2189_v33 = vmul.f32 %v3751_v62, %v2187_v7 }
0x1b8c   :  { %2191 = vrot.lane.b32.xlu1 %v2189_v33, %s4006_s5 }
0x1bfe   :  { %v2192_v9 = vpop.permute.xlu1 %2191 }
0x1bff   :  { %3341 = vmatmul.mubr.msk.f32.vlgmr.msra.gmra.mrb[16].mxu1 %vm383_vm2, %v2192_v9 }
0x1c00   :  { %3561 = vmatpush3.bf16.msra.mxu1 %v4599_v38  ;;  %3362 = vmatprep.mubr.msk.f32.mxu1 %vm4008_vm1, %v4009_v49 }
0x1c01   :  { %3562 = vmatprep.subr.bf16.mxu1 %v4007_v41 }
0x1c04   :  { %3564 = vmatpush3.bf16.msra.mxu1 %v4602_v17 }
0x1c05   :  { %3571 = vmatprep.subr.bf16.mxu1 %v4007_v41 }
0x1cd2   :  { %v2263_v12 = vpop.f32.mrb[16].mxu1 }
0x1cd3   :  { %v2264_v13 = vadd.f32 %v2263_v12, %v2193_v11  ;;  %v3342_v15 = vpop.f32.mrb[17].mxu1 }
0x1cd5   :  { %3754 = vtanh.f32 %v2264_v13  ;;  %v2960_v19 = vmul.f32 -1.442695, %v2264_v13 }
0x1cd7   :  { %3756 = vpow2.f32 %v2960_v19 }
0x1cdf   :  { %v3755_v18 = vpop.eup %3754 }
0x1ce0   :  { %2276 = vrot.lane.b32.xlu0 %v3755_v18, %s4005_s0 }
0x1ce1   :  { %v3757_v20 = vpop.eup %3756 }
0x1ce2   :  { %v2270_v21 = vadd.f32 1.0, %v3757_v20 }
0x1ce4   :  { %3758 = vrcp.f32 %v2270_v21 }
0x1cee   :  { %v3759_v44 = vpop.eup %3758 }
0x1cef   :  { %v2274_v25 = vmul.f32 %v3759_v44, %v2183_v5  ;;  %v2495_v5 = vrot.slane %v4591_v26, 2 }
0x1d52   :  { %v2277_v1 = vpop.permute.xlu0 %2276 }
0x1d53   :  { %v2279_v40 = vmul.f32 %v3759_v44, %v2277_v1 }
0x1d55   :  { %2281 = vrot.lane.b32.xlu1 %v2279_v40, %s4006_s5 }
0x1dc7   :  { %v2282_v22 = vpop.permute.xlu1 %2281 }
0x1dc8   :  { %v2284_v23 = vadd.f32 %v2282_v22, %v2274_v25  ;;  %v2596_v25 = vrot.slane %v4591_v26, 4 }
0x1dca   :  { %3760 = vtanh.f32 %v2284_v23 }
0x1dd4   :  { %v3761_v24 = vpop.eup %3760 }
0x1dd5   :  { %2287 = vrot.lane.b32.xlu0 %v3761_v24, %s4005_s0 }
0x1e47   :  { %v2288_v58 = vpop.permute.xlu0 %2287 }
0x1e48   :  { %v2290_v8 = vmul.f32 %v3759_v44, %v2288_v58 }
0x1e4a   :  { %2292 = vrot.lane.b32.xlu1 %v2290_v8, %s4006_s5 }
0x1ebc   :  { %v2293_v55 = vpop.permute.xlu1 %2292 }
0x1ebd   :  { %3352 = vmatmul.mubr.msk.f32.vlgmr.msra.gmra.mrb[22].mxu0 %vm383_vm2, %v2293_v55 }
0x1ebe   :  { %3567 = vmatpush3.bf16.msra.mxu0 %v4599_v38  ;;  %3373 = vmatprep.mubr.msk.f32.mxu0 %vm4008_vm1, %v4009_v49 }
0x1ebf   :  { %3568 = vmatprep.subr.bf16.mxu0 %v4007_v41 }
0x1ec2   :  { %3570 = vmatpush3.bf16.msra.mxu0 %v4602_v17 }
0x1ec3   :  { %3577 = vmatprep.subr.bf16.mxu0 %v4007_v41 }
0x1f90   :  { %v2364_v27 = vpop.f32.mrb[22].mxu0 }
0x1f91   :  { %v2365_v10 = vadd.f32 %v2364_v27, %v2294_v4  ;;  %v3353_v42 = vpop.f32.mrb[23].mxu0 }
0x1f93   :  { %3762 = vtanh.f32 %v2365_v10  ;;  %v2962_v30 = vmul.f32 -1.442695, %v2365_v10 }
0x1f95   :  { %3764 = vpow2.f32 %v2962_v30 }
0x1f9d   :  { %v3763_v29 = vpop.eup %3762 }
0x1f9e   :  { %2377 = vrot.lane.b32.xlu0 %v3763_v29, %s4005_s0  ;;  %v2952_v29 = vld [vmem:[%s4747_s12] ss:$0 sm:$0xff] }
0x1f9f   :  { %v3765_v31 = vpop.eup %3764 }
0x1fa0   :  { %v2371_v32 = vadd.f32 1.0, %v3765_v31 }
0x1fa2   :  { %3766 = vrcp.f32 %v2371_v32  ;;  %v2033_v32 = vadd.f32 %v4589_v16, %v2952_v29 }
0x1fac   :  { %v3767_v35 = vpop.eup %3766 }
0x1fad   :  { %v2375_v36 = vmul.f32 %v3767_v35, %v2284_v23 }
0x2010   :  { %v2378_v34 = vpop.permute.xlu0 %2377 }
0x2011   :  { %v2380_v46 = vmul.f32 %v3767_v35, %v2378_v34 }
0x2013   :  { %2382 = vrot.lane.b32.xlu1 %v2380_v46, %s4006_s5  ;;  %v2956_v46 = vmul.f32 -1.442695, %v2033_v32 }
0x2085   :  { %v2383_v50 = vpop.permute.xlu1 %2382 }
0x2086   :  { %v2385_v28 = vadd.f32 %v2383_v50, %v2375_v36 }
0x2088   :  { %3768 = vtanh.f32 %v2385_v28 }
0x2092   :  { %v3769_v37 = vpop.eup %3768 }
0x2093   :  { %2388 = vrot.lane.b32.xlu0 %v3769_v37, %s4005_s0 }
0x2105   :  { %v2389_v51 = vpop.permute.xlu0 %2388 }
0x2106   :  { %v2391_v14 = vmul.f32 %v3767_v35, %v2389_v51 }
0x2108   :  { %2393 = vrot.lane.b32.xlu1 %v2391_v14, %s4006_s5 }
0x217a   :  { %v2394_v39 = vpop.permute.xlu1 %2393 }
0x217b   :  { %3363 = vmatmul.mubr.msk.f32.vlgmr.msra.gmra.mrb[18].mxu1 %vm383_vm2, %v2394_v39 }
0x217c   :  { %3573 = vmatpush3.bf16.msra.mxu1 %v4599_v38  ;;  %3384 = vmatprep.mubr.msk.f32.mxu1 %vm4008_vm1, %v4009_v49 }
0x217d   :  { %3574 = vmatprep.subr.bf16.mxu1 %v4007_v41 }
0x2180   :  { %3576 = vmatpush3.bf16.msra.mxu1 %v4602_v17 }
0x2181   :  { %3583 = vmatprep.subr.bf16.mxu1 %v4007_v41 }
0x224e   :  { %v2463_v43 = vpop.f32.mrb[18].mxu1 }
0x224f   :  { %v2464_v45 = vadd.f32 %v2463_v43, %v4591_v26  ;;  %v3364_v47 = vpop.f32.mrb[19].mxu1 }
0x2251   :  { %3770 = vtanh.f32 %v2464_v45  ;;  %v2964_v52 = vmul.f32 -1.442695, %v2464_v45 }
0x2253   :  { %3772 = vpow2.f32 %v2964_v52  ;;  %v2697_v52 = vrot.slane %v4591_v26, 6 }
0x225b   :  { %v3771_v48 = vpop.eup %3770 }
0x225c   :  { %2476 = vrot.lane.b32.xlu0 %v3771_v48, %s4005_s0 }
0x225d   :  { %v3773_v53 = vpop.eup %3772 }
0x225e   :  { %v2470_v54 = vadd.f32 1.0, %v3773_v53 }
0x2260   :  { %3774 = vrcp.f32 %v2470_v54 }
0x226a   :  { %v3775_v56 = vpop.eup %3774 }
0x226b   :  { %v2474_v60 = vmul.f32 %v3775_v56, %v2385_v28 }
0x22ce   :  { %v2477_v57 = vpop.permute.xlu0 %2476 }
0x22cf   :  { %v2479_v59 = vmul.f32 %v3775_v56, %v2477_v57 }
0x22d1   :  { %2481 = vrot.lane.b32.xlu1 %v2479_v59, %s4006_s5 }
0x2343   :  { %v2482_v61 = vpop.permute.xlu1 %2481 }
0x2344   :  { %v2484_v62 = vadd.f32 %v2482_v61, %v2474_v60 }
0x2346   :  { %3776 = vtanh.f32 %v2484_v62 }
0x2350   :  { %v3777_v63 = vpop.eup %3776 }
0x2351   :  { %2487 = vrot.lane.b32.xlu0 %v3777_v63, %s4005_s0 }
0x23c3   :  { %v2488_v0 = vpop.permute.xlu0 %2487 }
0x23c4   :  { %v2490_v2 = vmul.f32 %v3775_v56, %v2488_v0 }
0x23c6   :  { %2492 = vrot.lane.b32.xlu1 %v2490_v2, %s4006_s5 }
0x2438   :  { %v2493_v3 = vpop.permute.xlu1 %2492 }
0x2439   :  { %3374 = vmatmul.mubr.msk.f32.vlgmr.msra.gmra.mrb[24].mxu0 %vm383_vm2, %v2493_v3 }
0x243a   :  { %3579 = vmatpush3.bf16.msra.mxu0 %v4599_v38  ;;  %3395 = vmatprep.mubr.msk.f32.mxu0 %vm4008_vm1, %v4009_v49 }
0x243b   :  { %3580 = vmatprep.subr.bf16.mxu0 %v4007_v41 }
0x243e   :  { %3582 = vmatpush3.bf16.msra.mxu0 %v4602_v17 }
0x250c   :  { %v2565_v6 = vpop.f32.mrb[24].mxu0 }
0x250d   :  { %v2566_v7 = vadd.f32 %v2565_v6, %v2495_v5  ;;  %v3375_v33 = vpop.f32.mrb[25].mxu0  ;;  %v2805_v5 = vld [vmem:[%s4748_s13] sm:$0xff]  ;;  %v2806_v6 = vld [vmem:[%s4748_s13 + $0x8] sm:$0xff] }
0x250e   :  { %v3584_v33 = vpack.c.bf16 %v2806_v6, %v2805_v5 }
0x250f   :  { %3778 = vtanh.f32 %v2566_v7  ;;  %v2966_v11 = vmul.f32 -1.442695, %v2566_v7  ;;  %v2807_v7 = vld [vmem:[%s4748_s13 + $0x10] sm:$0xff] }
0x2511   :  { %3780 = vpow2.f32 %v2966_v11 }
0x2519   :  { %v3779_v9 = vpop.eup %3778 }
0x251a   :  { %2578 = vrot.lane.b32.xlu0 %v3779_v9, %s4005_s0  ;;  %v2808_v9 = vld [vmem:[%s4748_s13 + $0x18] sm:$0xff] }
0x251b   :  { %v3781_v12 = vpop.eup %3780  ;;  %v3587_v11 = vpack.c.bf16 %v2808_v9, %v2807_v7 }
0x251c   :  { %v2572_v38 = vadd.f32 1.0, %v3781_v12  ;;  %v2809_v12 = vld [vmem:[%s4748_s13 + $0x20] sm:$0xff] }
0x251e   :  { %3782 = vrcp.f32 %v2572_v38  ;;  %v2810_v38 = vld [vmem:[%s4748_s13 + $0x28] sm:$0xff] }
0x2528   :  { %v3783_v13 = vpop.eup %3782 }
0x2529   :  { %v2576_v17 = vmul.f32 %v3783_v13, %v2484_v62 }
0x258c   :  { %v2579_v15 = vpop.permute.xlu0 %2578 }
0x258d   :  { %v2581_v18 = vmul.f32 %v3783_v13, %v2579_v15  ;;  %v3590_v15 = vpack.c.bf16 %v2810_v38, %v2809_v12 }
0x258f   :  { %2583 = vrot.lane.b32.xlu1 %v2581_v18, %s4006_s5 }
0x2601   :  { %v2584_v19 = vpop.permute.xlu1 %2583 }
0x2602   :  { %v2586_v20 = vadd.f32 %v2584_v19, %v2576_v17  ;;  %v2811_v17 = vld [vmem:[%s4748_s13 + $0x30] sm:$0xff]  ;;  %v2812_v19 = vld [vmem:[%s4748_s13 + $0x38] sm:$0xff]  ;;  %s4010_s13 = smov [#allocation14]  }
0x2603   :  { %s2901_s18 = sshll.u32 %s4010_s13, 4  ;;  %s2902_s18 = int_to_ptr.vmem [resolvable:$true] %s2901_s18 }
0x2604   :  { %3784 = vtanh.f32 %v2586_v20  ;;  %p3969_p1 = scmp.lt.s32.totalorder %s2902_s18, %s2902_s18 }
0x260e   :  { %v3785_v21 = vpop.eup %3784 }
0x260f   :  { %2589 = vrot.lane.b32.xlu0 %v3785_v21, %s4005_s0  ;;  %v3593_v21 = vpack.c.bf16 %v2812_v19, %v2811_v17 }
0x2681   :  { %v2590_v44 = vpop.permute.xlu0 %2589 }
0x2682   :  { %v2592_v1 = vmul.f32 %v3783_v13, %v2590_v44 }
0x2684   :  { %2594 = vrot.lane.b32.xlu1 %v2592_v1, %s4006_s5 }
0x26f6   :  { %v2595_v40 = vpop.permute.xlu1 %2594 }
0x26f7   :  { %3385 = vmatmul.mubr.msk.f32.vlgmr.msra.gmra.mrb[20].mxu1 %vm383_vm2, %v2595_v40 }
0x26f8   :  { %3414 = vmatprep.mubr.msk.f32.mxu1 %vm4008_vm1, %v4009_v49  ;;  %3585 = vmatpush3.bf16.msra.mxu1 %v3584_v33 }
0x26f9   :  { %3586 = vmatprep.subr.bf16.mxu1 %v4007_v41 }
0x26fc   :  { %3588 = vmatpush3.bf16.msra.mxu1 %v3587_v11 }
0x26fd   :  { %3589 = vmatprep.subr.bf16.mxu1 %v4007_v41 }
0x2700   :  { %3591 = vmatpush3.bf16.msra.mxu1 %v3590_v15 }
0x2701   :  { %3592 = vmatprep.subr.bf16.mxu1 %v4007_v41 }
0x2704   :  { %3594 = vmatpush3.bf16.msra.mxu1 %v3593_v21 }
0x27ca   :  { %v2666_v22 = vpop.f32.mrb[20].mxu1 }
0x27cb   :  { %v2667_v23 = vadd.f32 %v2666_v22, %v2596_v25  ;;  %v3386_v24 = vpop.f32.mrb[21].mxu1 }
0x27cc   :  { %v2971_v24 = vld [vmem:[#allocation13] ss:$0 sm:$0xff] }
0x27cd   :  { %3786 = vtanh.f32 %v2667_v23  ;;  %v2968_v8 = vmul.f32 -1.442695, %v2667_v23 }
0x27cf   :  { %3788 = vpow2.f32 %v2968_v8 }
0x27d7   :  { %v3787_v58 = vpop.eup %3786 }
0x27d8   :  { %2679 = vrot.lane.b32.xlu0 %v3787_v58, %s4005_s0 }
0x27d9   :  { %v3789_v55 = vpop.eup %3788 }
0x27da   :  { %v2673_v4 = vadd.f32 1.0, %v3789_v55 }
0x27dc   :  { %3790 = vrcp.f32 %v2673_v4 }
0x27e6   :  { %v3791_v27 = vpop.eup %3790 }
0x27e7   :  { %v2677_v49 = vmul.f32 %v3791_v27, %v2586_v20 }
0x284a   :  { %v2680_v10 = vpop.permute.xlu0 %2679 }
0x284b   :  { %v2682_v42 = vmul.f32 %v3791_v27, %v2680_v10 }
0x284d   :  { %2684 = vrot.lane.b32.xlu1 %v2682_v42, %s4006_s5 }
0x28bf   :  { %v2685_v30 = vpop.permute.xlu1 %2684 }
0x28c0   :  { %v2687_v31 = vadd.f32 %v2685_v30, %v2677_v49 }
0x28c2   :  { %3792 = vtanh.f32 %v2687_v31 }
0x28c3   :  { %3794 = vtanh.f32 %v2033_v32 }
0x28c4   :  { %3796 = vpow2.f32 %v2956_v46 }
0x28cc   :  { %v3793_v35 = vpop.eup %3792 }
0x28cd   :  { %2690 = vrot.lane.b32.xlu0 %v3793_v35, %s4005_s0  ;;  %v3795_v34 = vpop.eup %3794 }
0x28ce   :  { %v3797_v36 = vpop.eup %3796 }
0x28cf   :  { %v2067_v50 = vadd.f32 1.0, %v3797_v36 }
0x28d1   :  { %2073 = vrot.lane.b32.xlu0 %v3795_v34, %s4005_s0  ;;  %3798 = vrcp.f32 %v2067_v50 }
0x28db   :  { %v3799_v51 = vpop.eup %3798 }
0x28dc   :  { %v2071_v43 = vmul.f32 0.0, %v3799_v51 }
0x293f   :  { %v2691_v28 = vpop.permute.xlu0 %2690 }
0x2940   :  { %v2693_v37 = vmul.f32 %v3791_v27, %v2691_v28 }
0x2942   :  { %2695 = vrot.lane.b32.xlu1 %v2693_v37, %s4006_s5 }
0x2943   :  { %v2074_v14 = vpop.permute.xlu0 %2073 }
0x2944   :  { %v2076_v16 = vmul.f32 %v3799_v51, %v2074_v14 }
0x2946   :  { %2078 = vrot.lane.b32.xlu0 %v2076_v16, %s4006_s5 }
0x29b4   :  { %v2696_v39 = vpop.permute.xlu1 %2695 }
0x29b5   :  { %3396 = vmatmul.mubr.msk.f32.vlgmr.msra.gmra.mrb[26].mxu0 %vm383_vm2, %v2696_v39 }
0x29b8   :  { %v2079_v45 = vpop.permute.xlu0 %2078 }
0x29b9   :  { %v2081_v47 = vadd.f32 %v2079_v45, %v2071_v43 }
0x29bb   :  { %3800 = vtanh.f32 %v2081_v47 }
0x29c5   :  { %v3801_v48 = vpop.eup %3800 }
0x29c6   :  { %2084 = vrot.lane.b32.xlu0 %v3801_v48, %s4005_s0 }
0x2a38   :  { %v2085_v13 = vpop.permute.xlu0 %2084 }
0x2a39   :  { %v2087_v18 = vmul.f32 %v3799_v51, %v2085_v13 }
0x2a3b   :  { %v2800_v44 = vrot.slane %v2087_v18, 6 }
0x2a88   :  { %v2767_v53 = vpop.f32.mrb[26].mxu0 }
0x2a89   :  { %v2768_v54 = vadd.f32 %v2767_v53, %v2697_v52  ;;  %v3397_v56 = vpop.f32.mrb[27].mxu0 }
0x2a8b   :  { %3802 = vtanh.f32 %v2768_v54  ;;  %v2970_v59 = vmul.f32 -1.442695, %v2768_v54 }
0x2a8d   :  { %3804 = vpow2.f32 %v2970_v59 }
0x2a95   :  { %v3803_v57 = vpop.eup %3802 }
0x2a96   :  { %2780 = vrot.lane.b32.xlu1 %v3803_v57, %s4005_s0 }
0x2a97   :  { %v3805_v60 = vpop.eup %3804 }
0x2a98   :  { %v2774_v61 = vadd.f32 1.0, %v3805_v60 }
0x2a9a   :  { %3806 = vrcp.f32 %v2774_v61 }
0x2aa4   :  { %v3807_v62 = vpop.eup %3806 }
0x2aa5   :  { %v2778_v2 = vmul.f32 %v3807_v62, %v2687_v31 }
0x2b08   :  { %v2781_v63 = vpop.permute.xlu1 %2780 }
0x2b09   :  { %v2783_v0 = vmul.f32 %v3807_v62, %v2781_v63 }
0x2b0b   :  { %2785 = vrot.lane.b32.xlu1 %v2783_v0, %s4006_s5 }
0x2b7d   :  { %v2786_v3 = vpop.permute.xlu1 %2785 }
0x2b7e   :  { %v2788_v26 = vadd.f32 %v2786_v3, %v2778_v2 }
0x2b80   :  { %3808 = vtanh.f32 %v2788_v26 }
0x2b8a   :  { %v3809_v20 = vpop.eup %3808 }
0x2b8b   :  { %2791 = vrot.lane.b32.xlu1 %v3809_v20, %s4005_s0 }
0x2b8f   :  { %2801 = vrot.lane.b32.xlu1 %v2800_v44, %s4005_s0  ;;  %s3964_s0 = scalar_lea.vmem %s2902_s18, 32 }
0x2b90   :  { %p3965_p0 = scmp.ne.s32.totalorder %s2902_s18, %s3964_s0  ;;  %p3970_p2 = scmp.lt.s32.totalorder %s3964_s0, %s3964_s0 }
0x2b92   :  { %p3971_p3 = por %p3970_p2, %p3969_p1 }
0x2b94   :  { %p3972_p4 = pnand %p3971_p3, %p3965_p0 }
0x2bfd   :  { %v2792_v1 = vpop.permute.xlu1 %2791 }
0x2bfe   :  { %v2794_v40 = vmul.f32 %v3807_v62, %v2792_v1 }
0x2c00   :  { %2796 = vrot.lane.b32.xlu0 %v2794_v40, %s4006_s5 }
0x2c01   :  { %v2802_v25 = vpop.permute.xlu1 %2801 }
0x2c72   :  { %v2797_v22 = vpop.permute.xlu0 %2796 }
0x2c73   :  { %v2804_v23 = vsel %vm383_vm2, %v2797_v22, %v2802_v25 }
0x2c74   :  { %3415 = vmatmul.mubr.msk.f32.vlgmr.msra.gmra.mrb[22].mxu1 %vm1865_vm6, %v2804_v23 }
0x2d47   :  { %v2889_v58 = vpop.f32.mrb[22].mxu1 }
0x2d48   :  { %v2890_v8 = vadd.f32 %v2971_v24, %v2889_v58  ;;  %v3416_v41 = vpop.f32.mrb[23].mxu1 }
0x2d4a   :  { %2894 = vst.msk [vmem:[#allocation14] sm:$0x3] %vm2893_vm7, %v2890_v8 }
0x2d4b   :  { %3975 = shalt.err (!%p3972_p4)
}
0x2d4c   :  { %s3976_s23 = scalar_lea.hbm %s4750_s15, 32 }
0x2d4d   :  { %p3977_p5 = scmp.ne.s32.totalorder %s4750_s15, %s3976_s23  ;;  %p3980_p6 = scmp.lt.u32.totalorder %s3976_s23, %s4750_s15 }
0x2d4f   :  { %p3982_p7 = pnand %p3980_p6, %p3977_p5 }
0x2d51   :  { %3985 = shalt.err (!%p3982_p7)
}
0x2d52   :  { %2904 = dma.vmem_to_hbm [thread:$0]  %s2902_s18, 32, %s4750_s15, [#allocation4]  }
0x2d53   :  { %3994 = dma.done.wait [#allocation4], 32  }
0x2d54   :  { %3995 = vsyncadd [#allocation4], 4294967264 }
0x2d55   :  { %2908 = vsyncpa [#allocation3], 1 }
0x2d56   :  { %2909 = vsyncpa [#allocation6], 1 }
0x2d57   :  { %2910 = vsyncpa [#allocation9], 1 }
0x2d58   :  { %2911 = vsyncpa [#allocation12], 1 }
0x2d59   :  { %2912 = vsyncpa [#allocation4], 1 }

</bundles_post_ra>
